<compile_context>
chip_gen: v7x
topology: tpu7x:2x2x1
jax: 0.10.0
libtpu: 0.0.40
codegen_flags: <defaults>
</compile_context>

<pallas_src>
import numpy as np
import jax
import jax.numpy as jnp
from jax import lax
from jax.experimental import pallas as pl
from jax.experimental.pallas import tpu as pltpu


# ----------------------------------------------------------------------------
# Fused forward kernel.  One grid step == TILE_B images.
# ----------------------------------------------------------------------------
def _autoencoder_kernel(
    x_ref,                                   # (TB, 16, 48)  lanes = w*3 + c
    we1, be1, we2, be2, we3, be3,            # encoder band matrices / biases
    dw1, db1, dw2, db2, dw3, db3,            # decoder packed weights / biases
    o_ref,                                   # (TB, 2, 384)
    pad1, cv1, pad2, cv2, pad3, cv3,         # VMEM scratch
):
    f32 = jnp.float32

    def conv_relu_pool(x_val, w_ref, b_ref, pad_scr, conv_scr, H):
        """3x3 conv (padding=1) + bias + ReLU + 2x2 max-pool, lane-dense.

        x_val   : (TB, H, L_in) activations, lane = w * stride + c
        w_ref   : (6, L_in, 128) band matrices; rows [0:3] are the 3 vertical
                  taps, rows [3:6] are the same taps with the output columns
                  shifted by Cout lanes (gives the "w+1" neighbour needed for
                  the W max-pool with no lane roll / gather).
        b_ref   : (2, 128) bias and column-shifted bias.
        returns : (TB, H//2, 128) pooled, valid lanes at 2*w2*Cout + c.
        """
        TB, _, L_in = pad_scr.shape
        rows = TB * H

        # Zero-pad in H only; W padding is folded into the band matrices.
        # Only the two border rows need zeroing — the interior is fully
        # overwritten every step.
        zrow = jnp.zeros((TB, 1, L_in), f32)
        pad_scr[:, 0:1, :] = zrow
        pad_scr[:, H + 1:H + 2, :] = zrow
        pad_scr[:, 1:H + 1, :] = x_val

        # 3 vertical taps x (plain + column-shifted) band matmuls on the MXU.
        xw = pad_scr[:, pl.ds(0, H), :].reshape(rows, L_in)
        acc = jnp.dot(xw, w_ref[0], preferred_element_type=f32)
        acc_s = jnp.dot(xw, w_ref[3], preferred_element_type=f32)
        for dy in (1, 2):
            xw = pad_scr[:, pl.ds(dy, H), :].reshape(rows, L_in)
            acc = acc + jnp.dot(xw, w_ref[dy], preferred_element_type=f32)
            acc_s = acc_s + jnp.dot(xw, w_ref[dy + 3], preferred_element_type=f32)

        y = jnp.maximum(acc + b_ref[0:1, :], 0.0)       # ReLU(conv at w)
        ys = jnp.maximum(acc_s + b_ref[1:2, :], 0.0)    # ReLU(conv at w+1)
        # W max-pool (pair-max in lanes), then H max-pool via strided rows.
        conv_scr[...] = jnp.maximum(y, ys).reshape(TB, H, 128)
        H2 = H // 2
        return jnp.maximum(conv_scr[:, pl.ds(0, H2, 2), :],
                           conv_scr[:, pl.ds(1, H2, 2), :])

    # ---------------- encoder ----------------
    h = conv_relu_pool(x_ref[...], we1, be1, pad1, cv1, 16)   # (TB, 8, 128)
    h = conv_relu_pool(h, we2, be2, pad2, cv2, 8)             # (TB, 4, 128)
    h = conv_relu_pool(h, we3, be3, pad3, cv3, 4)             # (TB, 2, 128)

    # ---------------- decoder ----------------
    # ConvTranspose2d(k=2, s=2) is a per-pixel matmul with the 4 taps folded
    # into the lane dim; the whole decoder stays in this packed (block-diag)
    # layout so no scatter/interleave is needed in-kernel.  Rows = (b, i),
    # lanes = (j, taps..., c); lane widths 128 -> 256 -> 384, all vreg-dense.
    TB = o_ref.shape[0]
    z = h.reshape(TB * 2, 128)
    z = jnp.maximum(jnp.dot(z, dw1[...], preferred_element_type=f32) + db1[...], 0.0)
    z = jnp.maximum(jnp.dot(z, dw2[...], preferred_element_type=f32) + db2[...], 0.0)
    z = jnp.dot(z, dw3[...], preferred_element_type=f32) + db3[...]
    # Sigmoid: exp goes to the EUP; 1/(1+inf) = 0, so very negative z is fine.
    o_ref[...] = (1.0 / (1.0 + jnp.exp(-z))).reshape(TB, 2, 384)


# ----------------------------------------------------------------------------
# Weight preparation (pure layout transforms on ~9K params; done on host/XLA).
# ----------------------------------------------------------------------------
def _prep_weights(params):
    # ---- encoder: banded (block-Toeplitz) matrices over the (w, c) lane dim.
    enc_args = []
    widths = [16, 8, 4]
    s_in = 3                                   # lane stride between w positions
    for (w, b), W in zip(params["enc"], widths):
        w = np.asarray(w, np.float32)          # (Cout, Cin, 3, 3) OIHW
        b = np.asarray(b, np.float32)
        cout, cin = w.shape[0], w.shape[1]
        l_in, l_out = W * s_in, W * cout       # l_out == 128 for every layer
        band = np.zeros((3, l_in, l_out), np.float32)
        for dy in range(3):
            for wo in range(W):
                for dx in range(3):
                    wi = wo + dx - 1
                    if 0 <= wi < W:            # W zero-padding handled here
                        band[dy, wi * s_in:wi * s_in + cin,
                             wo * cout:(wo + 1) * cout] = w[:, :, dy, dx].T
        # Column-shifted copies: produce the "w+1" conv output for the W-pool.
        band_s = np.concatenate(
            [band[:, :, cout:], np.zeros((3, l_in, cout), np.float32)], axis=2)
        bias = np.tile(b, W)
        bias_s = np.concatenate([bias[cout:], np.zeros(cout, np.float32)])
        enc_args += [jnp.asarray(np.concatenate([band, band_s], axis=0)),  # (6,l_in,128)
                     jnp.asarray(np.stack([bias, bias_s], axis=0))]        # (2,128)
        s_in = 2 * cout                        # pooled output is lane-dilated

    # ---- decoder: tap-factored, block-diagonal packed weights (lane-dense).
    (w1, b1), (w2, b2), (w3, b3) = [
        (np.asarray(w, np.float32), np.asarray(b, np.float32))
        for w, b in params["dec"]]
    m1 = np.transpose(w1, (0, 2, 3, 1)).reshape(32, 64)   # cin -> (dy, dx, cout)
    blk1 = np.concatenate([m1, np.zeros((32, 64), np.float32)], axis=0)  # skip dilated lanes
    dW1 = np.kron(np.eye(2, dtype=np.float32), blk1)      # (128, 128), blocks over j
    dB1 = np.tile(b1, 8).reshape(1, 128)
    m2 = np.transpose(w2, (0, 2, 3, 1)).reshape(16, 32)
    dW2 = np.kron(np.eye(8, dtype=np.float32), m2)        # (128, 256)
    dB2 = np.tile(b2, 32).reshape(1, 256)
    m3 = np.transpose(w3, (0, 2, 3, 1)).reshape(8, 12)
    dW3 = np.kron(np.eye(32, dtype=np.float32), m3)       # (256, 384)
    dB3 = np.tile(b3, 128).reshape(1, 384)
    dec_args = [jnp.asarray(a) for a in (dW1, dB1, dW2, dB2, dW3, dB3)]
    return enc_args, dec_args


def _pick_tile_b(batch, max_tile=8):
    cands = [d for d in range(1, min(batch, max_tile) + 1) if batch % d == 0]
    pref = [d for d in cands if batch // d >= 2]   # keep >=2 grid steps (v7x: 2 TCs)
    return max(pref) if pref else max(cands)


# ----------------------------------------------------------------------------
# Public forward (NCHW in / NCHW out, matching the PyTorch module)
# ----------------------------------------------------------------------------
def autoencoder_forward(x_nchw, params):
    x = jnp.transpose(x_nchw, (0, 2, 3, 1)).astype(jnp.float32)   # NCHW -> NHWC
    B, H, W, Cin = x.shape
    assert (H, W, Cin) == (16, 16, 3), "script specialised for (B, 3, 16, 16)"
    x2d = x.reshape(B, 16, 48)                                    # lanes = (w, c)

    enc_args, dec_args = _prep_weights(params)
    tb = _pick_tile_b(B)
    grid = (B // tb,)

    def wspec(a):
        return pl.BlockSpec(a.shape, lambda g, _n=a.ndim: (0,) * _n)

    in_specs = ([pl.BlockSpec((tb, 16, 48), lambda g: (g, 0, 0))]
                + [wspec(a) for a in enc_args]
                + [wspec(a) for a in dec_args])

    scratch = [
        pltpu.VMEM((tb, 18, 48), jnp.float32),    # pad1: H-padded layer-1 input
        pltpu.VMEM((tb, 16, 128), jnp.float32),   # conv1: W-pooled, pre-H-pool
        pltpu.VMEM((tb, 10, 128), jnp.float32),   # pad2
        pltpu.VMEM((tb, 8, 128), jnp.float32),    # conv2
        pltpu.VMEM((tb, 6, 128), jnp.float32),    # pad3
        pltpu.VMEM((tb, 4, 128), jnp.float32),    # conv3
    ]

    out = pl.pallas_call(
        _autoencoder_kernel,
        grid=grid,
        out_shape=jax.ShapeDtypeStruct((B, 2, 384), jnp.float32),
        in_specs=in_specs,
        out_specs=pl.BlockSpec((tb, 2, 384), lambda g: (g, 0, 0)),
        scratch_shapes=scratch,
        compiler_params=pltpu.CompilerParams(
            dimension_semantics=("parallel",),          # shard batch over TCs
            vmem_limit_bytes=32 * 1024 * 1024),
    )(x2d, *enc_args, *dec_args)

    # Unpack the tap-factored output:
    #   out[b, i, lane] with lane = (((j, dy1), dx1, dy2, dx2, dy3, dx3), c)
    y = out.reshape(B, 2, 2, 2, 2, 2, 2, 2, 2, 3)   # (b,i,j,dy1,dx1,dy2,dx2,dy3,dx3,c)
    y = jnp.transpose(y, (0, 1, 3, 5, 7, 2, 4, 6, 8, 9)).reshape(B, 16, 16, 3)
    return jnp.transpose(y, (0, 3, 1, 2))            # NHWC -> NCHW


# ----------------------------------------------------------------------------
# Parameters (PyTorch layouts), deterministic init
# ----------------------------------------------------------------------------
def init_params(key):
    def uinit(k, shape, fan_in):
        bound = 1.0 / (fan_in ** 0.5)
        return jax.random.uniform(k, shape, jnp.float32, -bound, bound)

    enc_dims = [(3, 8), (8, 16), (16, 32)]
    dec_dims = [(32, 16), (16, 8), (8, 3)]
    params = {"enc": [], "dec": []}
    for cin, cout in enc_dims:
        key, kw, kb = jax.random.split(key, 3)
        params["enc"].append((uinit(kw, (cout, cin, 3, 3), cin * 9),   # OIHW
                              uinit(kb, (cout,), cin * 9)))
    for cin, cout in dec_dims:
        key, kw, kb = jax.random.split(key, 3)
        params["dec"].append((uinit(kw, (cin, cout, 2, 2), cin * 4),   # (Cin,Cout,kH,kW)
                              uinit(kb, (cout,), cin * 4)))
    return params


# ----------------------------------------------------------------------------
# Pure-JAX reference (XLA) for correctness checking
# ----------------------------------------------------------------------------
def ref_forward(x_nchw, params):
    h = x_nchw.astype(jnp.float32)
    for w, b in params["enc"]:
        h = lax.conv_general_dilated(h, w, (1, 1), ((1, 1), (1, 1)),
                                     dimension_numbers=("NCHW", "OIHW", "NCHW"))
        h = jnp.maximum(h + b[None, :, None, None], 0.0)
        B, C, H, W = h.shape
        h = h.reshape(B, C, H // 2, 2, W // 2, 2).max(axis=(3, 5))
    n_dec = len(params["dec"])
    for i, (w, b) in enumerate(params["dec"]):
        B, C, H, W = h.shape
        cout = w.shape[1]
        y = jnp.einsum("bchw,cokl->bohkwl", h, w).reshape(B, cout, 2 * H, 2 * W)
        y = y + b[None, :, None, None]
        h = jnp.maximum(y, 0.0) if i < n_dec - 1 else jax.nn.sigmoid(y)
    return h


if __name__ == "__main__":
    key = jax.random.PRNGKey(0)
    kx, kp = jax.random.split(key)
    x = jax.random.uniform(kx, (2, 3, 16, 16), jnp.float32)  # NCHW, like PyTorch
    params = init_params(kp)

    out = autoencoder_forward(x, params)
    out = jax.block_until_ready(out)

    ref = jax.block_until_ready(ref_forward(x, params))
    assert out.shape == (2, 3, 16, 16), out.shape
    assert jnp.allclose(out, ref, atol=1e-4, rtol=1e-4), float(jnp.max(jnp.abs(out - ref)))

    print("KERNEL_OK")
</pallas_src>

<mosaic_0001>
module attributes {stable_mosaic.version = 11 : i64} {
  func.func @_autoencoder_kernel(%arg0: i32, %arg1: memref<1x16x48xf32, #tpu.memory_space<vmem>>, %arg2: memref<6x48x128xf32, #tpu.memory_space<vmem>>, %arg3: memref<2x128xf32, #tpu.memory_space<vmem>>, %arg4: memref<6x128x128xf32, #tpu.memory_space<vmem>>, %arg5: memref<2x128xf32, #tpu.memory_space<vmem>>, %arg6: memref<6x128x128xf32, #tpu.memory_space<vmem>>, %arg7: memref<2x128xf32, #tpu.memory_space<vmem>>, %arg8: memref<128x128xf32, #tpu.memory_space<vmem>>, %arg9: memref<1x128xf32, #tpu.memory_space<vmem>>, %arg10: memref<128x256xf32, #tpu.memory_space<vmem>>, %arg11: memref<1x256xf32, #tpu.memory_space<vmem>>, %arg12: memref<256x384xf32, #tpu.memory_space<vmem>>, %arg13: memref<1x384xf32, #tpu.memory_space<vmem>>, %arg14: memref<1x2x384xf32, #tpu.memory_space<vmem>>, %arg15: memref<1x18x48xf32, #tpu.memory_space<vmem>>, %arg16: memref<1x16x128xf32, #tpu.memory_space<vmem>>, %arg17: memref<1x10x128xf32, #tpu.memory_space<vmem>>, %arg18: memref<1x8x128xf32, #tpu.memory_space<vmem>>, %arg19: memref<1x6x128xf32, #tpu.memory_space<vmem>>, %arg20: memref<1x4x128xf32, #tpu.memory_space<vmem>>) attributes {dimension_semantics = [#tpu.dimension_semantics<parallel>], iteration_bounds = array<i64: 2>, scalar_prefetch = 0 : i64, scratch_operands = 6 : i64, tpu.core_type = #tpu.core_type<tc>, window_params = [{transform_indices = @transform_0, window_bounds = array<i64: 1, 16, 48>}, {pipeline_mode = #tpu.pipeline_mode<synchronous>, transform_indices = @transform_1, window_bounds = array<i64: 6, 48, 128>}, {pipeline_mode = #tpu.pipeline_mode<synchronous>, transform_indices = @transform_2, window_bounds = array<i64: 2, 128>}, {pipeline_mode = #tpu.pipeline_mode<synchronous>, transform_indices = @transform_3, window_bounds = array<i64: 6, 128, 128>}, {pipeline_mode = #tpu.pipeline_mode<synchronous>, transform_indices = @transform_4, window_bounds = array<i64: 2, 128>}, {pipeline_mode = #tpu.pipeline_mode<synchronous>, transform_indices = @transform_5, window_bounds = array<i64: 6, 128, 128>}, {pipeline_mode = #tpu.pipeline_mode<synchronous>, transform_indices = @transform_6, window_bounds = array<i64: 2, 128>}, {pipeline_mode = #tpu.pipeline_mode<synchronous>, transform_indices = @transform_7, window_bounds = array<i64: 128, 128>}, {pipeline_mode = #tpu.pipeline_mode<synchronous>, transform_indices = @transform_8, window_bounds = array<i64: 1, 128>}, {pipeline_mode = #tpu.pipeline_mode<synchronous>, transform_indices = @transform_9, window_bounds = array<i64: 128, 256>}, {pipeline_mode = #tpu.pipeline_mode<synchronous>, transform_indices = @transform_10, window_bounds = array<i64: 1, 256>}, {pipeline_mode = #tpu.pipeline_mode<synchronous>, transform_indices = @transform_11, window_bounds = array<i64: 256, 384>}, {pipeline_mode = #tpu.pipeline_mode<synchronous>, transform_indices = @transform_12, window_bounds = array<i64: 1, 384>}, {transform_indices = @transform_13, window_bounds = array<i64: 1, 2, 384>}]} {
    %c0 = arith.constant 0 : index
    %c0_0 = arith.constant 0 : index
    %c0_1 = arith.constant 0 : index
    %0 = vector.load %arg1[%c0, %c0_0, %c0_1] : memref<1x16x48xf32, #tpu.memory_space<vmem>>, vector<1x16x48xf32>
    %cst = arith.constant 0.000000e+00 : f32
    %1 = vector.broadcast %cst : f32 to vector<1x1x48xf32>
    %c0_2 = arith.constant 0 : index
    %c0_3 = arith.constant 0 : index
    %c0_4 = arith.constant 0 : index
    %2 = vector.load %arg15[%c0_2, %c0_3, %c0_4] : memref<1x18x48xf32, #tpu.memory_space<vmem>>, vector<1x1x48xf32>
    tpu.vector_store %arg15[%c0_2, %c0_3, %c0_4], %1 {strides = array<i32>} : memref<1x18x48xf32, #tpu.memory_space<vmem>>, vector<1x1x48xf32>,
    %c0_5 = arith.constant 0 : index
    %c17 = arith.constant 17 : index
    %c0_6 = arith.constant 0 : index
    %3 = vector.load %arg15[%c0_5, %c17, %c0_6] : memref<1x18x48xf32, #tpu.memory_space<vmem>>, vector<1x1x48xf32>
    tpu.vector_store %arg15[%c0_5, %c17, %c0_6], %1 {strides = array<i32>} : memref<1x18x48xf32, #tpu.memory_space<vmem>>, vector<1x1x48xf32>,
    %c0_7 = arith.constant 0 : index
    %c1 = arith.constant 1 : index
    %c0_8 = arith.constant 0 : index
    %4 = vector.load %arg15[%c0_7, %c1, %c0_8] : memref<1x18x48xf32, #tpu.memory_space<vmem>>, vector<1x16x48xf32>
    tpu.vector_store %arg15[%c0_7, %c1, %c0_8], %0 {strides = array<i32>} : memref<1x18x48xf32, #tpu.memory_space<vmem>>, vector<1x16x48xf32>,
    %c0_9 = arith.constant 0 : index
    %c0_10 = arith.constant 0 : index
    %c0_11 = arith.constant 0 : index
    %5 = vector.load %arg15[%c0_9, %c0_10, %c0_11] : memref<1x18x48xf32, #tpu.memory_space<vmem>>, vector<1x16x48xf32>
    %6 = vector.shape_cast %5 : vector<1x16x48xf32> to vector<16x48xf32>
    %c0_12 = arith.constant 0 : index
    %c0_13 = arith.constant 0 : index
    %c0_14 = arith.constant 0 : index
    %7 = vector.load %arg2[%c0_12, %c0_13, %c0_14] : memref<6x48x128xf32, #tpu.memory_space<vmem>>, vector<1x48x128xf32>
    %8 = vector.shape_cast %7 : vector<1x48x128xf32> to vector<48x128xf32>
    %cst_15 = arith.constant dense<0.000000e+00> : vector<16x128xf32>
    %9 = tpu.matmul %6, %8, %cst_15 {dimension_numbers = #tpu.dot_dimension_numbers<[1], [0], [0], [1], [0, 0, 1, 1], [], []>} : vector<16x48xf32>, vector<48x128xf32>, vector<16x128xf32> -> vector<16x128xf32>
    %c3 = arith.constant 3 : index
    %c0_16 = arith.constant 0 : index
    %c0_17 = arith.constant 0 : index
    %10 = vector.load %arg2[%c3, %c0_16, %c0_17] : memref<6x48x128xf32, #tpu.memory_space<vmem>>, vector<1x48x128xf32>
    %11 = vector.shape_cast %10 : vector<1x48x128xf32> to vector<48x128xf32>
    %cst_18 = arith.constant dense<0.000000e+00> : vector<16x128xf32>
    %12 = tpu.matmul %6, %11, %cst_18 {dimension_numbers = #tpu.dot_dimension_numbers<[1], [0], [0], [1], [0, 0, 1, 1], [], []>} : vector<16x48xf32>, vector<48x128xf32>, vector<16x128xf32> -> vector<16x128xf32>
    %c0_19 = arith.constant 0 : index
    %c1_20 = arith.constant 1 : index
    %c0_21 = arith.constant 0 : index
    %13 = vector.load %arg15[%c0_19, %c1_20, %c0_21] : memref<1x18x48xf32, #tpu.memory_space<vmem>>, vector<1x16x48xf32>
    %14 = vector.shape_cast %13 : vector<1x16x48xf32> to vector<16x48xf32>
    %c1_22 = arith.constant 1 : index
    %c0_23 = arith.constant 0 : index
    %c0_24 = arith.constant 0 : index
    %15 = vector.load %arg2[%c1_22, %c0_23, %c0_24] : memref<6x48x128xf32, #tpu.memory_space<vmem>>, vector<1x48x128xf32>
    %16 = vector.shape_cast %15 : vector<1x48x128xf32> to vector<48x128xf32>
    %cst_25 = arith.constant dense<0.000000e+00> : vector<16x128xf32>
    %17 = tpu.matmul %14, %16, %cst_25 {dimension_numbers = #tpu.dot_dimension_numbers<[1], [0], [0], [1], [0, 0, 1, 1], [], []>} : vector<16x48xf32>, vector<48x128xf32>, vector<16x128xf32> -> vector<16x128xf32>
    %18 = arith.addf %9, %17 : vector<16x128xf32>
    %c4 = arith.constant 4 : index
    %c0_26 = arith.constant 0 : index
    %c0_27 = arith.constant 0 : index
    %19 = vector.load %arg2[%c4, %c0_26, %c0_27] : memref<6x48x128xf32, #tpu.memory_space<vmem>>, vector<1x48x128xf32>
    %20 = vector.shape_cast %19 : vector<1x48x128xf32> to vector<48x128xf32>
    %cst_28 = arith.constant dense<0.000000e+00> : vector<16x128xf32>
    %21 = tpu.matmul %14, %20, %cst_28 {dimension_numbers = #tpu.dot_dimension_numbers<[1], [0], [0], [1], [0, 0, 1, 1], [], []>} : vector<16x48xf32>, vector<48x128xf32>, vector<16x128xf32> -> vector<16x128xf32>
    %22 = arith.addf %12, %21 : vector<16x128xf32>
    %c0_29 = arith.constant 0 : index
    %c2 = arith.constant 2 : index
    %c0_30 = arith.constant 0 : index
    %23 = vector.load %arg15[%c0_29, %c2, %c0_30] : memref<1x18x48xf32, #tpu.memory_space<vmem>>, vector<1x16x48xf32>
    %24 = vector.shape_cast %23 : vector<1x16x48xf32> to vector<16x48xf32>
    %c2_31 = arith.constant 2 : index
    %c0_32 = arith.constant 0 : index
    %c0_33 = arith.constant 0 : index
    %25 = vector.load %arg2[%c2_31, %c0_32, %c0_33] : memref<6x48x128xf32, #tpu.memory_space<vmem>>, vector<1x48x128xf32>
    %26 = vector.shape_cast %25 : vector<1x48x128xf32> to vector<48x128xf32>
    %cst_34 = arith.constant dense<0.000000e+00> : vector<16x128xf32>
    %27 = tpu.matmul %24, %26, %cst_34 {dimension_numbers = #tpu.dot_dimension_numbers<[1], [0], [0], [1], [0, 0, 1, 1], [], []>} : vector<16x48xf32>, vector<48x128xf32>, vector<16x128xf32> -> vector<16x128xf32>
    %28 = arith.addf %18, %27 : vector<16x128xf32>
    %c5 = arith.constant 5 : index
    %c0_35 = arith.constant 0 : index
    %c0_36 = arith.constant 0 : index
    %29 = vector.load %arg2[%c5, %c0_35, %c0_36] : memref<6x48x128xf32, #tpu.memory_space<vmem>>, vector<1x48x128xf32>
    %30 = vector.shape_cast %29 : vector<1x48x128xf32> to vector<48x128xf32>
    %cst_37 = arith.constant dense<0.000000e+00> : vector<16x128xf32>
    %31 = tpu.matmul %24, %30, %cst_37 {dimension_numbers = #tpu.dot_dimension_numbers<[1], [0], [0], [1], [0, 0, 1, 1], [], []>} : vector<16x48xf32>, vector<48x128xf32>, vector<16x128xf32> -> vector<16x128xf32>
    %32 = arith.addf %22, %31 : vector<16x128xf32>
    %c0_38 = arith.constant 0 : index
    %c0_39 = arith.constant 0 : index
    %33 = vector.load %arg3[%c0_38, %c0_39] : memref<2x128xf32, #tpu.memory_space<vmem>>, vector<1x128xf32>
    %34 = vector.broadcast %33 : vector<1x128xf32> to vector<16x128xf32>
    %35 = arith.addf %28, %34 : vector<16x128xf32>
    %cst_40 = arith.constant 0.000000e+00 : f32
    %36 = vector.broadcast %cst_40 : f32 to vector<16x128xf32>
    %37 = arith.maximumf %35, %36 : vector<16x128xf32>
    %c1_41 = arith.constant 1 : index
    %c0_42 = arith.constant 0 : index
    %38 = vector.load %arg3[%c1_41, %c0_42] : memref<2x128xf32, #tpu.memory_space<vmem>>, vector<1x128xf32>
    %39 = vector.broadcast %38 : vector<1x128xf32> to vector<16x128xf32>
    %40 = arith.addf %32, %39 : vector<16x128xf32>
    %cst_43 = arith.constant 0.000000e+00 : f32
    %41 = vector.broadcast %cst_43 : f32 to vector<16x128xf32>
    %42 = arith.maximumf %40, %41 : vector<16x128xf32>
    %43 = arith.maximumf %37, %42 : vector<16x128xf32>
    %44 = vector.shape_cast %43 : vector<16x128xf32> to vector<1x16x128xf32>
    %c0_44 = arith.constant 0 : index
    %c0_45 = arith.constant 0 : index
    %c0_46 = arith.constant 0 : index
    %45 = vector.load %arg16[%c0_44, %c0_45, %c0_46] : memref<1x16x128xf32, #tpu.memory_space<vmem>>, vector<1x16x128xf32>
    tpu.vector_store %arg16[%c0_44, %c0_45, %c0_46], %44 {strides = array<i32>} : memref<1x16x128xf32, #tpu.memory_space<vmem>>, vector<1x16x128xf32>,
    %c0_47 = arith.constant 0 : index
    %c0_48 = arith.constant 0 : index
    %c0_49 = arith.constant 0 : index
    %46 = tpu.strided_load %arg16[%c0_47, %c0_48, %c0_49] {strides = array<i32: 1, 2, 1>} : memref<1x16x128xf32, #tpu.memory_space<vmem>>, vector<1x8x128xf32>
    %c0_50 = arith.constant 0 : index
    %c1_51 = arith.constant 1 : index
    %c0_52 = arith.constant 0 : index
    %47 = tpu.strided_load %arg16[%c0_50, %c1_51, %c0_52] {strides = array<i32: 1, 2, 1>} : memref<1x16x128xf32, #tpu.memory_space<vmem>>, vector<1x8x128xf32>
    %48 = arith.maximumf %46, %47 : vector<1x8x128xf32>
    %cst_53 = arith.constant 0.000000e+00 : f32
    %49 = vector.broadcast %cst_53 : f32 to vector<1x1x128xf32>
    %c0_54 = arith.constant 0 : index
    %c0_55 = arith.constant 0 : index
    %c0_56 = arith.constant 0 : index
    %50 = vector.load %arg17[%c0_54, %c0_55, %c0_56] : memref<1x10x128xf32, #tpu.memory_space<vmem>>, vector<1x1x128xf32>
    tpu.vector_store %arg17[%c0_54, %c0_55, %c0_56], %49 {strides = array<i32>} : memref<1x10x128xf32, #tpu.memory_space<vmem>>, vector<1x1x128xf32>,
    %c0_57 = arith.constant 0 : index
    %c9 = arith.constant 9 : index
    %c0_58 = arith.constant 0 : index
    %51 = vector.load %arg17[%c0_57, %c9, %c0_58] : memref<1x10x128xf32, #tpu.memory_space<vmem>>, vector<1x1x128xf32>
    tpu.vector_store %arg17[%c0_57, %c9, %c0_58], %49 {strides = array<i32>} : memref<1x10x128xf32, #tpu.memory_space<vmem>>, vector<1x1x128xf32>,
    %c0_59 = arith.constant 0 : index
    %c1_60 = arith.constant 1 : index
    %c0_61 = arith.constant 0 : index
    %52 = vector.load %arg17[%c0_59, %c1_60, %c0_61] : memref<1x10x128xf32, #tpu.memory_space<vmem>>, vector<1x8x128xf32>
    tpu.vector_store %arg17[%c0_59, %c1_60, %c0_61], %48 {strides = array<i32>} : memref<1x10x128xf32, #tpu.memory_space<vmem>>, vector<1x8x128xf32>,
    %c0_62 = arith.constant 0 : index
    %c0_63 = arith.constant 0 : index
    %c0_64 = arith.constant 0 : index
    %53 = vector.load %arg17[%c0_62, %c0_63, %c0_64] : memref<1x10x128xf32, #tpu.memory_space<vmem>>, vector<1x8x128xf32>
    %54 = vector.shape_cast %53 : vector<1x8x128xf32> to vector<8x128xf32>
    %c0_65 = arith.constant 0 : index
    %c0_66 = arith.constant 0 : index
    %c0_67 = arith.constant 0 : index
    %55 = vector.load %arg4[%c0_65, %c0_66, %c0_67] : memref<6x128x128xf32, #tpu.memory_space<vmem>>, vector<1x128x128xf32>
    %56 = vector.shape_cast %55 : vector<1x128x128xf32> to vector<128x128xf32>
    %cst_68 = arith.constant dense<0.000000e+00> : vector<8x128xf32>
    %57 = tpu.matmul %54, %56, %cst_68 {dimension_numbers = #tpu.dot_dimension_numbers<[1], [0], [0], [1], [0, 0, 1, 1], [], []>} : vector<8x128xf32>, vector<128x128xf32>, vector<8x128xf32> -> vector<8x128xf32>
    %c3_69 = arith.constant 3 : index
    %c0_70 = arith.constant 0 : index
    %c0_71 = arith.constant 0 : index
    %58 = vector.load %arg4[%c3_69, %c0_70, %c0_71] : memref<6x128x128xf32, #tpu.memory_space<vmem>>, vector<1x128x128xf32>
    %59 = vector.shape_cast %58 : vector<1x128x128xf32> to vector<128x128xf32>
    %cst_72 = arith.constant dense<0.000000e+00> : vector<8x128xf32>
    %60 = tpu.matmul %54, %59, %cst_72 {dimension_numbers = #tpu.dot_dimension_numbers<[1], [0], [0], [1], [0, 0, 1, 1], [], []>} : vector<8x128xf32>, vector<128x128xf32>, vector<8x128xf32> -> vector<8x128xf32>
    %c0_73 = arith.constant 0 : index
    %c1_74 = arith.constant 1 : index
    %c0_75 = arith.constant 0 : index
    %61 = vector.load %arg17[%c0_73, %c1_74, %c0_75] : memref<1x10x128xf32, #tpu.memory_space<vmem>>, vector<1x8x128xf32>
    %62 = vector.shape_cast %61 : vector<1x8x128xf32> to vector<8x128xf32>
    %c1_76 = arith.constant 1 : index
    %c0_77 = arith.constant 0 : index
    %c0_78 = arith.constant 0 : index
    %63 = vector.load %arg4[%c1_76, %c0_77, %c0_78] : memref<6x128x128xf32, #tpu.memory_space<vmem>>, vector<1x128x128xf32>
    %64 = vector.shape_cast %63 : vector<1x128x128xf32> to vector<128x128xf32>
    %cst_79 = arith.constant dense<0.000000e+00> : vector<8x128xf32>
    %65 = tpu.matmul %62, %64, %cst_79 {dimension_numbers = #tpu.dot_dimension_numbers<[1], [0], [0], [1], [0, 0, 1, 1], [], []>} : vector<8x128xf32>, vector<128x128xf32>, vector<8x128xf32> -> vector<8x128xf32>
    %66 = arith.addf %57, %65 : vector<8x128xf32>
    %c4_80 = arith.constant 4 : index
    %c0_81 = arith.constant 0 : index
    %c0_82 = arith.constant 0 : index
    %67 = vector.load %arg4[%c4_80, %c0_81, %c0_82] : memref<6x128x128xf32, #tpu.memory_space<vmem>>, vector<1x128x128xf32>
    %68 = vector.shape_cast %67 : vector<1x128x128xf32> to vector<128x128xf32>
    %cst_83 = arith.constant dense<0.000000e+00> : vector<8x128xf32>
    %69 = tpu.matmul %62, %68, %cst_83 {dimension_numbers = #tpu.dot_dimension_numbers<[1], [0], [0], [1], [0, 0, 1, 1], [], []>} : vector<8x128xf32>, vector<128x128xf32>, vector<8x128xf32> -> vector<8x128xf32>
    %70 = arith.addf %60, %69 : vector<8x128xf32>
    %c0_84 = arith.constant 0 : index
    %c2_85 = arith.constant 2 : index
    %c0_86 = arith.constant 0 : index
    %71 = vector.load %arg17[%c0_84, %c2_85, %c0_86] : memref<1x10x128xf32, #tpu.memory_space<vmem>>, vector<1x8x128xf32>
    %72 = vector.shape_cast %71 : vector<1x8x128xf32> to vector<8x128xf32>
    %c2_87 = arith.constant 2 : index
    %c0_88 = arith.constant 0 : index
    %c0_89 = arith.constant 0 : index
    %73 = vector.load %arg4[%c2_87, %c0_88, %c0_89] : memref<6x128x128xf32, #tpu.memory_space<vmem>>, vector<1x128x128xf32>
    %74 = vector.shape_cast %73 : vector<1x128x128xf32> to vector<128x128xf32>
    %cst_90 = arith.constant dense<0.000000e+00> : vector<8x128xf32>
    %75 = tpu.matmul %72, %74, %cst_90 {dimension_numbers = #tpu.dot_dimension_numbers<[1], [0], [0], [1], [0, 0, 1, 1], [], []>} : vector<8x128xf32>, vector<128x128xf32>, vector<8x128xf32> -> vector<8x128xf32>
    %76 = arith.addf %66, %75 : vector<8x128xf32>
    %c5_91 = arith.constant 5 : index
    %c0_92 = arith.constant 0 : index
    %c0_93 = arith.constant 0 : index
    %77 = vector.load %arg4[%c5_91, %c0_92, %c0_93] : memref<6x128x128xf32, #tpu.memory_space<vmem>>, vector<1x128x128xf32>
    %78 = vector.shape_cast %77 : vector<1x128x128xf32> to vector<128x128xf32>
    %cst_94 = arith.constant dense<0.000000e+00> : vector<8x128xf32>
    %79 = tpu.matmul %72, %78, %cst_94 {dimension_numbers = #tpu.dot_dimension_numbers<[1], [0], [0], [1], [0, 0, 1, 1], [], []>} : vector<8x128xf32>, vector<128x128xf32>, vector<8x128xf32> -> vector<8x128xf32>
    %80 = arith.addf %70, %79 : vector<8x128xf32>
    %c0_95 = arith.constant 0 : index
    %c0_96 = arith.constant 0 : index
    %81 = vector.load %arg5[%c0_95, %c0_96] : memref<2x128xf32, #tpu.memory_space<vmem>>, vector<1x128xf32>
    %82 = vector.broadcast %81 : vector<1x128xf32> to vector<8x128xf32>
    %83 = arith.addf %76, %82 : vector<8x128xf32>
    %cst_97 = arith.constant 0.000000e+00 : f32
    %84 = vector.broadcast %cst_97 : f32 to vector<8x128xf32>
    %85 = arith.maximumf %83, %84 : vector<8x128xf32>
    %c1_98 = arith.constant 1 : index
    %c0_99 = arith.constant 0 : index
    %86 = vector.load %arg5[%c1_98, %c0_99] : memref<2x128xf32, #tpu.memory_space<vmem>>, vector<1x128xf32>
    %87 = vector.broadcast %86 : vector<1x128xf32> to vector<8x128xf32>
    %88 = arith.addf %80, %87 : vector<8x128xf32>
    %cst_100 = arith.constant 0.000000e+00 : f32
    %89 = vector.broadcast %cst_100 : f32 to vector<8x128xf32>
    %90 = arith.maximumf %88, %89 : vector<8x128xf32>
    %91 = arith.maximumf %85, %90 : vector<8x128xf32>
    %92 = vector.shape_cast %91 : vector<8x128xf32> to vector<1x8x128xf32>
    %c0_101 = arith.constant 0 : index
    %c0_102 = arith.constant 0 : index
    %c0_103 = arith.constant 0 : index
    %93 = vector.load %arg18[%c0_101, %c0_102, %c0_103] : memref<1x8x128xf32, #tpu.memory_space<vmem>>, vector<1x8x128xf32>
    tpu.vector_store %arg18[%c0_101, %c0_102, %c0_103], %92 {strides = array<i32>} : memref<1x8x128xf32, #tpu.memory_space<vmem>>, vector<1x8x128xf32>,
    %c0_104 = arith.constant 0 : index
    %c0_105 = arith.constant 0 : index
    %c0_106 = arith.constant 0 : index
    %94 = tpu.strided_load %arg18[%c0_104, %c0_105, %c0_106] {strides = array<i32: 1, 2, 1>} : memref<1x8x128xf32, #tpu.memory_space<vmem>>, vector<1x4x128xf32>
    %c0_107 = arith.constant 0 : index
    %c1_108 = arith.constant 1 : index
    %c0_109 = arith.constant 0 : index
    %95 = tpu.strided_load %arg18[%c0_107, %c1_108, %c0_109] {strides = array<i32: 1, 2, 1>} : memref<1x8x128xf32, #tpu.memory_space<vmem>>, vector<1x4x128xf32>
    %96 = arith.maximumf %94, %95 : vector<1x4x128xf32>
    %cst_110 = arith.constant 0.000000e+00 : f32
    %97 = vector.broadcast %cst_110 : f32 to vector<1x1x128xf32>
    %c0_111 = arith.constant 0 : index
    %c0_112 = arith.constant 0 : index
    %c0_113 = arith.constant 0 : index
    %98 = vector.load %arg19[%c0_111, %c0_112, %c0_113] : memref<1x6x128xf32, #tpu.memory_space<vmem>>, vector<1x1x128xf32>
    tpu.vector_store %arg19[%c0_111, %c0_112, %c0_113], %97 {strides = array<i32>} : memref<1x6x128xf32, #tpu.memory_space<vmem>>, vector<1x1x128xf32>,
    %c0_114 = arith.constant 0 : index
    %c5_115 = arith.constant 5 : index
    %c0_116 = arith.constant 0 : index
    %99 = vector.load %arg19[%c0_114, %c5_115, %c0_116] : memref<1x6x128xf32, #tpu.memory_space<vmem>>, vector<1x1x128xf32>
    tpu.vector_store %arg19[%c0_114, %c5_115, %c0_116], %97 {strides = array<i32>} : memref<1x6x128xf32, #tpu.memory_space<vmem>>, vector<1x1x128xf32>,
    %c0_117 = arith.constant 0 : index
    %c1_118 = arith.constant 1 : index
    %c0_119 = arith.constant 0 : index
    %100 = vector.load %arg19[%c0_117, %c1_118, %c0_119] : memref<1x6x128xf32, #tpu.memory_space<vmem>>, vector<1x4x128xf32>
    tpu.vector_store %arg19[%c0_117, %c1_118, %c0_119], %96 {strides = array<i32>} : memref<1x6x128xf32, #tpu.memory_space<vmem>>, vector<1x4x128xf32>,
    %c0_120 = arith.constant 0 : index
    %c0_121 = arith.constant 0 : index
    %c0_122 = arith.constant 0 : index
    %101 = vector.load %arg19[%c0_120, %c0_121, %c0_122] : memref<1x6x128xf32, #tpu.memory_space<vmem>>, vector<1x4x128xf32>
    %102 = vector.shape_cast %101 : vector<1x4x128xf32> to vector<4x128xf32>
    %c0_123 = arith.constant 0 : index
    %c0_124 = arith.constant 0 : index
    %c0_125 = arith.constant 0 : index
    %103 = vector.load %arg6[%c0_123, %c0_124, %c0_125] : memref<6x128x128xf32, #tpu.memory_space<vmem>>, vector<1x128x128xf32>
    %104 = vector.shape_cast %103 : vector<1x128x128xf32> to vector<128x128xf32>
    %cst_126 = arith.constant dense<0.000000e+00> : vector<4x128xf32>
    %105 = tpu.matmul %102, %104, %cst_126 {dimension_numbers = #tpu.dot_dimension_numbers<[1], [0], [0], [1], [0, 0, 1, 1], [], []>} : vector<4x128xf32>, vector<128x128xf32>, vector<4x128xf32> -> vector<4x128xf32>
    %c3_127 = arith.constant 3 : index
    %c0_128 = arith.constant 0 : index
    %c0_129 = arith.constant 0 : index
    %106 = vector.load %arg6[%c3_127, %c0_128, %c0_129] : memref<6x128x128xf32, #tpu.memory_space<vmem>>, vector<1x128x128xf32>
    %107 = vector.shape_cast %106 : vector<1x128x128xf32> to vector<128x128xf32>
    %cst_130 = arith.constant dense<0.000000e+00> : vector<4x128xf32>
    %108 = tpu.matmul %102, %107, %cst_130 {dimension_numbers = #tpu.dot_dimension_numbers<[1], [0], [0], [1], [0, 0, 1, 1], [], []>} : vector<4x128xf32>, vector<128x128xf32>, vector<4x128xf32> -> vector<4x128xf32>
    %c0_131 = arith.constant 0 : index
    %c1_132 = arith.constant 1 : index
    %c0_133 = arith.constant 0 : index
    %109 = vector.load %arg19[%c0_131, %c1_132, %c0_133] : memref<1x6x128xf32, #tpu.memory_space<vmem>>, vector<1x4x128xf32>
    %110 = vector.shape_cast %109 : vector<1x4x128xf32> to vector<4x128xf32>
    %c1_134 = arith.constant 1 : index
    %c0_135 = arith.constant 0 : index
    %c0_136 = arith.constant 0 : index
    %111 = vector.load %arg6[%c1_134, %c0_135, %c0_136] : memref<6x128x128xf32, #tpu.memory_space<vmem>>, vector<1x128x128xf32>
    %112 = vector.shape_cast %111 : vector<1x128x128xf32> to vector<128x128xf32>
    %cst_137 = arith.constant dense<0.000000e+00> : vector<4x128xf32>
    %113 = tpu.matmul %110, %112, %cst_137 {dimension_numbers = #tpu.dot_dimension_numbers<[1], [0], [0], [1], [0, 0, 1, 1], [], []>} : vector<4x128xf32>, vector<128x128xf32>, vector<4x128xf32> -> vector<4x128xf32>
    %114 = arith.addf %105, %113 : vector<4x128xf32>
    %c4_138 = arith.constant 4 : index
    %c0_139 = arith.constant 0 : index
    %c0_140 = arith.constant 0 : index
    %115 = vector.load %arg6[%c4_138, %c0_139, %c0_140] : memref<6x128x128xf32, #tpu.memory_space<vmem>>, vector<1x128x128xf32>
    %116 = vector.shape_cast %115 : vector<1x128x128xf32> to vector<128x128xf32>
    %cst_141 = arith.constant dense<0.000000e+00> : vector<4x128xf32>
    %117 = tpu.matmul %110, %116, %cst_141 {dimension_numbers = #tpu.dot_dimension_numbers<[1], [0], [0], [1], [0, 0, 1, 1], [], []>} : vector<4x128xf32>, vector<128x128xf32>, vector<4x128xf32> -> vector<4x128xf32>
    %118 = arith.addf %108, %117 : vector<4x128xf32>
    %c0_142 = arith.constant 0 : index
    %c2_143 = arith.constant 2 : index
    %c0_144 = arith.constant 0 : index
    %119 = vector.load %arg19[%c0_142, %c2_143, %c0_144] : memref<1x6x128xf32, #tpu.memory_space<vmem>>, vector<1x4x128xf32>
    %120 = vector.shape_cast %119 : vector<1x4x128xf32> to vector<4x128xf32>
    %c2_145 = arith.constant 2 : index
    %c0_146 = arith.constant 0 : index
    %c0_147 = arith.constant 0 : index
    %121 = vector.load %arg6[%c2_145, %c0_146, %c0_147] : memref<6x128x128xf32, #tpu.memory_space<vmem>>, vector<1x128x128xf32>
    %122 = vector.shape_cast %121 : vector<1x128x128xf32> to vector<128x128xf32>
    %cst_148 = arith.constant dense<0.000000e+00> : vector<4x128xf32>
    %123 = tpu.matmul %120, %122, %cst_148 {dimension_numbers = #tpu.dot_dimension_numbers<[1], [0], [0], [1], [0, 0, 1, 1], [], []>} : vector<4x128xf32>, vector<128x128xf32>, vector<4x128xf32> -> vector<4x128xf32>
    %124 = arith.addf %114, %123 : vector<4x128xf32>
    %c5_149 = arith.constant 5 : index
    %c0_150 = arith.constant 0 : index
    %c0_151 = arith.constant 0 : index
    %125 = vector.load %arg6[%c5_149, %c0_150, %c0_151] : memref<6x128x128xf32, #tpu.memory_space<vmem>>, vector<1x128x128xf32>
    %126 = vector.shape_cast %125 : vector<1x128x128xf32> to vector<128x128xf32>
    %cst_152 = arith.constant dense<0.000000e+00> : vector<4x128xf32>
    %127 = tpu.matmul %120, %126, %cst_152 {dimension_numbers = #tpu.dot_dimension_numbers<[1], [0], [0], [1], [0, 0, 1, 1], [], []>} : vector<4x128xf32>, vector<128x128xf32>, vector<4x128xf32> -> vector<4x128xf32>
    %128 = arith.addf %118, %127 : vector<4x128xf32>
    %c0_153 = arith.constant 0 : index
    %c0_154 = arith.constant 0 : index
    %129 = vector.load %arg7[%c0_153, %c0_154] : memref<2x128xf32, #tpu.memory_space<vmem>>, vector<1x128xf32>
    %130 = vector.broadcast %129 : vector<1x128xf32> to vector<4x128xf32>
    %131 = arith.addf %124, %130 : vector<4x128xf32>
    %cst_155 = arith.constant 0.000000e+00 : f32
    %132 = vector.broadcast %cst_155 : f32 to vector<4x128xf32>
    %133 = arith.maximumf %131, %132 : vector<4x128xf32>
    %c1_156 = arith.constant 1 : index
    %c0_157 = arith.constant 0 : index
    %134 = vector.load %arg7[%c1_156, %c0_157] : memref<2x128xf32, #tpu.memory_space<vmem>>, vector<1x128xf32>
    %135 = vector.broadcast %134 : vector<1x128xf32> to vector<4x128xf32>
    %136 = arith.addf %128, %135 : vector<4x128xf32>
    %cst_158 = arith.constant 0.000000e+00 : f32
    %137 = vector.broadcast %cst_158 : f32 to vector<4x128xf32>
    %138 = arith.maximumf %136, %137 : vector<4x128xf32>
    %139 = arith.maximumf %133, %138 : vector<4x128xf32>
    %140 = vector.shape_cast %139 : vector<4x128xf32> to vector<1x4x128xf32>
    %c0_159 = arith.constant 0 : index
    %c0_160 = arith.constant 0 : index
    %c0_161 = arith.constant 0 : index
    %141 = vector.load %arg20[%c0_159, %c0_160, %c0_161] : memref<1x4x128xf32, #tpu.memory_space<vmem>>, vector<1x4x128xf32>
    tpu.vector_store %arg20[%c0_159, %c0_160, %c0_161], %140 {strides = array<i32>} : memref<1x4x128xf32, #tpu.memory_space<vmem>>, vector<1x4x128xf32>,
    %c0_162 = arith.constant 0 : index
    %c0_163 = arith.constant 0 : index
    %c0_164 = arith.constant 0 : index
    %142 = tpu.strided_load %arg20[%c0_162, %c0_163, %c0_164] {strides = array<i32: 1, 2, 1>} : memref<1x4x128xf32, #tpu.memory_space<vmem>>, vector<1x2x128xf32>
    %c0_165 = arith.constant 0 : index
    %c1_166 = arith.constant 1 : index
    %c0_167 = arith.constant 0 : index
    %143 = tpu.strided_load %arg20[%c0_165, %c1_166, %c0_167] {strides = array<i32: 1, 2, 1>} : memref<1x4x128xf32, #tpu.memory_space<vmem>>, vector<1x2x128xf32>
    %144 = arith.maximumf %142, %143 : vector<1x2x128xf32>
    %145 = vector.shape_cast %144 : vector<1x2x128xf32> to vector<2x128xf32>
    %c0_168 = arith.constant 0 : index
    %c0_169 = arith.constant 0 : index
    %146 = vector.load %arg8[%c0_168, %c0_169] : memref<128x128xf32, #tpu.memory_space<vmem>>, vector<128x128xf32>
    %cst_170 = arith.constant dense<0.000000e+00> : vector<2x128xf32>
    %147 = tpu.matmul %145, %146, %cst_170 {dimension_numbers = #tpu.dot_dimension_numbers<[1], [0], [0], [1], [0, 0, 1, 1], [], []>} : vector<2x128xf32>, vector<128x128xf32>, vector<2x128xf32> -> vector<2x128xf32>
    %c0_171 = arith.constant 0 : index
    %c0_172 = arith.constant 0 : index
    %148 = vector.load %arg9[%c0_171, %c0_172] : memref<1x128xf32, #tpu.memory_space<vmem>>, vector<1x128xf32>
    %149 = vector.broadcast %148 : vector<1x128xf32> to vector<2x128xf32>
    %150 = arith.addf %147, %149 : vector<2x128xf32>
    %cst_173 = arith.constant 0.000000e+00 : f32
    %151 = vector.broadcast %cst_173 : f32 to vector<2x128xf32>
    %152 = arith.maximumf %150, %151 : vector<2x128xf32>
    %c0_174 = arith.constant 0 : index
    %c0_175 = arith.constant 0 : index
    %153 = vector.load %arg10[%c0_174, %c0_175] : memref<128x256xf32, #tpu.memory_space<vmem>>, vector<128x256xf32>
    %cst_176 = arith.constant dense<0.000000e+00> : vector<2x256xf32>
    %154 = tpu.matmul %152, %153, %cst_176 {dimension_numbers = #tpu.dot_dimension_numbers<[1], [0], [0], [1], [0, 0, 1, 1], [], []>} : vector<2x128xf32>, vector<128x256xf32>, vector<2x256xf32> -> vector<2x256xf32>
    %c0_177 = arith.constant 0 : index
    %c0_178 = arith.constant 0 : index
    %155 = vector.load %arg11[%c0_177, %c0_178] : memref<1x256xf32, #tpu.memory_space<vmem>>, vector<1x256xf32>
    %156 = vector.broadcast %155 : vector<1x256xf32> to vector<2x256xf32>
    %157 = arith.addf %154, %156 : vector<2x256xf32>
    %cst_179 = arith.constant 0.000000e+00 : f32
    %158 = vector.broadcast %cst_179 : f32 to vector<2x256xf32>
    %159 = arith.maximumf %157, %158 : vector<2x256xf32>
    %c0_180 = arith.constant 0 : index
    %c0_181 = arith.constant 0 : index
    %160 = vector.load %arg12[%c0_180, %c0_181] : memref<256x384xf32, #tpu.memory_space<vmem>>, vector<256x384xf32>
    %cst_182 = arith.constant dense<0.000000e+00> : vector<2x384xf32>
    %161 = tpu.matmul %159, %160, %cst_182 {dimension_numbers = #tpu.dot_dimension_numbers<[1], [0], [0], [1], [0, 0, 1, 1], [], []>} : vector<2x256xf32>, vector<256x384xf32>, vector<2x384xf32> -> vector<2x384xf32>
    %c0_183 = arith.constant 0 : index
    %c0_184 = arith.constant 0 : index
    %162 = vector.load %arg13[%c0_183, %c0_184] : memref<1x384xf32, #tpu.memory_space<vmem>>, vector<1x384xf32>
    %163 = vector.broadcast %162 : vector<1x384xf32> to vector<2x384xf32>
    %164 = arith.addf %161, %163 : vector<2x384xf32>
    %cst_185 = arith.constant 0.000000e+00 : f32
    %165 = vector.broadcast %cst_185 : f32 to vector<2x384xf32>
    %166 = arith.subf %165, %164 : vector<2x384xf32>
    %167 = math.exp %166 : vector<2x384xf32>
    %cst_186 = arith.constant 1.000000e+00 : f32
    %168 = vector.broadcast %cst_186 : f32 to vector<2x384xf32>
    %169 = arith.addf %168, %167 : vector<2x384xf32>
    %cst_187 = arith.constant 1.000000e+00 : f32
    %170 = vector.broadcast %cst_187 : f32 to vector<2x384xf32>
    %171 = arith.divf %170, %169 : vector<2x384xf32>
    %172 = vector.shape_cast %171 : vector<2x384xf32> to vector<1x2x384xf32>
    %c0_188 = arith.constant 0 : index
    %c0_189 = arith.constant 0 : index
    %c0_190 = arith.constant 0 : index
    %173 = vector.load %arg14[%c0_188, %c0_189, %c0_190] : memref<1x2x384xf32, #tpu.memory_space<vmem>>, vector<1x2x384xf32>
    tpu.vector_store %arg14[%c0_188, %c0_189, %c0_190], %172 {strides = array<i32>} : memref<1x2x384xf32, #tpu.memory_space<vmem>>, vector<1x2x384xf32>,
    return
  }
  func.func @transform_0(%arg0: i32) -> (i32, i32, i32) {
    %c0_i32 = arith.constant 0 : i32
    %c0_i32_0 = arith.constant 0 : i32
    %c0_i32_1 = arith.constant 0 : i32
    return %arg0, %c0_i32, %c0_i32_0 : i32, i32, i32
  }
  func.func @transform_1(%arg0: i32) -> (i32, i32, i32) {
    %c0_i32 = arith.constant 0 : i32
    %c0_i32_0 = arith.constant 0 : i32
    %c0_i32_1 = arith.constant 0 : i32
    %c0_i32_2 = arith.constant 0 : i32
    return %c0_i32, %c0_i32_0, %c0_i32_1 : i32, i32, i32
  }
  func.func @transform_2(%arg0: i32) -> (i32, i32) {
    %c0_i32 = arith.constant 0 : i32
    %c0_i32_0 = arith.constant 0 : i32
    %c0_i32_1 = arith.constant 0 : i32
    return %c0_i32, %c0_i32_0 : i32, i32
  }
  func.func @transform_3(%arg0: i32) -> (i32, i32, i32) {
    %c0_i32 = arith.constant 0 : i32
    %c0_i32_0 = arith.constant 0 : i32
    %c0_i32_1 = arith.constant 0 : i32
    %c0_i32_2 = arith.constant 0 : i32
    return %c0_i32, %c0_i32_0, %c0_i32_1 : i32, i32, i32
  }
  func.func @transform_4(%arg0: i32) -> (i32, i32) {
    %c0_i32 = arith.constant 0 : i32
    %c0_i32_0 = arith.constant 0 : i32
    %c0_i32_1 = arith.constant 0 : i32
    return %c0_i32, %c0_i32_0 : i32, i32
  }
  func.func @transform_5(%arg0: i32) -> (i32, i32, i32) {
    %c0_i32 = arith.constant 0 : i32
    %c0_i32_0 = arith.constant 0 : i32
    %c0_i32_1 = arith.constant 0 : i32
    %c0_i32_2 = arith.constant 0 : i32
    return %c0_i32, %c0_i32_0, %c0_i32_1 : i32, i32, i32
  }
  func.func @transform_6(%arg0: i32) -> (i32, i32) {
    %c0_i32 = arith.constant 0 : i32
    %c0_i32_0 = arith.constant 0 : i32
    %c0_i32_1 = arith.constant 0 : i32
    return %c0_i32, %c0_i32_0 : i32, i32
  }
  func.func @transform_7(%arg0: i32) -> (i32, i32) {
    %c0_i32 = arith.constant 0 : i32
    %c0_i32_0 = arith.constant 0 : i32
    %c0_i32_1 = arith.constant 0 : i32
    return %c0_i32, %c0_i32_0 : i32, i32
  }
  func.func @transform_8(%arg0: i32) -> (i32, i32) {
    %c0_i32 = arith.constant 0 : i32
    %c0_i32_0 = arith.constant 0 : i32
    %c0_i32_1 = arith.constant 0 : i32
    return %c0_i32, %c0_i32_0 : i32, i32
  }
  func.func @transform_9(%arg0: i32) -> (i32, i32) {
    %c0_i32 = arith.constant 0 : i32
    %c0_i32_0 = arith.constant 0 : i32
    %c0_i32_1 = arith.constant 0 : i32
    return %c0_i32, %c0_i32_0 : i32, i32
  }
  func.func @transform_10(%arg0: i32) -> (i32, i32) {
    %c0_i32 = arith.constant 0 : i32
    %c0_i32_0 = arith.constant 0 : i32
    %c0_i32_1 = arith.constant 0 : i32
    return %c0_i32, %c0_i32_0 : i32, i32
  }
  func.func @transform_11(%arg0: i32) -> (i32, i32) {
    %c0_i32 = arith.constant 0 : i32
    %c0_i32_0 = arith.constant 0 : i32
    %c0_i32_1 = arith.constant 0 : i32
    return %c0_i32, %c0_i32_0 : i32, i32
  }
  func.func @transform_12(%arg0: i32) -> (i32, i32) {
    %c0_i32 = arith.constant 0 : i32
    %c0_i32_0 = arith.constant 0 : i32
    %c0_i32_1 = arith.constant 0 : i32
    return %c0_i32, %c0_i32_0 : i32, i32
  }
  func.func @transform_13(%arg0: i32) -> (i32, i32, i32) {
    %c0_i32 = arith.constant 0 : i32
    %c0_i32_0 = arith.constant 0 : i32
    %c0_i32_1 = arith.constant 0 : i32
    return %arg0, %c0_i32, %c0_i32_0 : i32, i32, i32
  }
}

</mosaic_0001>

<bundles_post_ra>
// kernel: tpu_custom_call.1
= control target key start
LH: loop header
LB: loop body
LE: loop exit
PB: predicated region body
PF: predicated region fallthrough
CT: control target
= control target key end

     0   :  { %s5290_s0 = inlined_call_operand.hbm [shape: f32[2,16,48], index: 0, kind: input, shape index: {}]   ;;  %s5291_s1 = inlined_call_operand.hbm [shape: f32[6,48,128], index: 1, kind: input, shape index: {}]   ;;  %s5292_s2 = inlined_call_operand.vmem [shape: f32[2,128], index: 2, kind: input, shape index: {}]   ;;  %s5293_s3 = inlined_call_operand.hbm [shape: f32[6,128,128], index: 3, kind: input, shape index: {}]   ;;  %s5294_s4 = inlined_call_operand.vmem [shape: f32[2,128], index: 4, kind: input, shape index: {}]   ;;  %s5295_s5 = inlined_call_operand.hbm [shape: f32[6,128,128], index: 5, kind: input, shape index: {}]   ;;  %s5296_s6 = inlined_call_operand.vmem [shape: f32[2,128], index: 6, kind: input, shape index: {}]   ;;  %s5297_s7 = inlined_call_operand.hbm [shape: f32[128,128], index: 7, kind: input, shape index: {}]   ;;  %s5298_s8 = inlined_call_operand.vmem [shape: f32[1,128], index: 8, kind: input, shape index: {}]   ;;  %s5299_s9 = inlined_call_operand.hbm [shape: f32[128,256], index: 9, kind: input, shape index: {}]   ;;  %s5300_s10 = inlined_call_operand.vmem [shape: f32[1,256], index: 10, kind: input, shape index: {}]   ;;  %s5301_s11 = inlined_call_operand.hbm [shape: f32[256,384], index: 11, kind: input, shape index: {}]   ;;  %s5302_s12 = inlined_call_operand.vmem [shape: f32[1,384], index: 12, kind: input, shape index: {}]   ;;  %s5303_s13 = inlined_call_operand.hbm [shape: f32[2,2,384], index: 13, kind: output, shape index: {}]  }
   0x1   :  { %5313 = sst [smem:[#allocation26_spill]] %s5291_s1 }
   0x2   :  { %5314 = sst [smem:[#allocation27_spill]] %s5295_s5 }
   0x3   :  { %5315 = sst [smem:[#allocation28_spill]] %s5296_s6 }
   0x4   :  { %5316 = sst [smem:[#allocation29_spill]] %s5298_s8 }
   0x5   :  { %5317 = sst [smem:[#allocation30_spill]] %s5300_s10 }
   0x6   :  { %5318 = sst [smem:[#allocation31_spill]] %s5302_s12 }
   0x7   :  { %5319 = sst [smem:[#allocation32_spill]] %s5303_s13 }
   0x8   :  { %18 = vsyncpa [#allocation9], 0 }
   0x9   :  { %20 = vsyncpa [#allocation9 + $0x1], 0 }
   0xa   :  { %21 = vsyncpa [#allocation12], 0 }
   0xb   :  { %22 = vsyncpa [#allocation15], 0 }
   0xc   :  { %23 = vsyncpa [#allocation18], 0 }
   0xd   :  { %24 = vsyncpa [#allocation10], 0 }
   0xe   :  { %26 = vsyncpa [#allocation10 + $0x1], 0  ;;  %s4752_s25 = smov 0   ;;  %s4754_s26 = smov 0  }
   0xf   :  { %s4756_s27 = smov 0   ;;  %s4758_s28 = smov 0  }
  0x10 LB: > { %s4664_s29 = smov [#allocation11]   ;;  %s4773_s14 = sadd.s32 4294967295, %s4662_s28   ;;  %s4662_s28 = sphi %s4758_s28, %s5351_s28   ;;  %s4658_s27 = sphi %s4756_s27, %s5350_s27   ;;  %s4654_s26 = sphi %s4754_s26, %s5349_s26   ;;  %s4650_s25 = sphi %s4752_s25, %s5348_s25  }
  0x11   : > { %s353_s30 = sshll.u32 %s4664_s29, 4  ;;  %p2844_p0 = scmp.ge.s32.totalorder %s4662_s28, 1  ;;  %s4778_s30 = int_to_ptr.vmem [resolvable:$true] %s353_s30 }
  0x12   : > { %p5310_p1 = scmp.eq.s32.totalorder %s4773_s14, 0  ;;  %p341_p2 = scmp.lt.s32.totalorder %s4662_s28, 3 }
  0x13   : > { %s4665_s16 = smov [#allocation14]   ;;  %s4666_s19 = smov [#allocation17]  }
  0x14   : > { %p4780_p3 = pnand %p2844_p0, %p341_p2  ;;  %s385_s17 = sshll.u32 %s4665_s16, 4  ;;  %s4793_s17 = int_to_ptr.vmem [resolvable:$true] %s385_s17 }
  0x15   : > { %s417_s20 = sshll.u32 %s4666_s19, 4  ;;  %s5322_s1 = sld [smem:[#allocation26_spill]]  ;;  %s4795_s20 = int_to_ptr.vmem [resolvable:$true] %s417_s20 }
  0x16   : > { %s5320_s15 = scalar_select %p4780_p3, 1, 0 }
  0x17   : > { %p4285_p5 = pneg %p4780_p3 }
  0x19   : > { %p4789_p6 = pnand %p4285_p5, %p5310_p1 }
  0x1b   : > { %s4386_s23 = scalar_lea.hbm %s5322_s1, 4608  ;;  %p4805_p8 = pneg %p4789_p6 }
  0x1c   : > { %p4387_p7 = scmp.ne.s32.totalorder %s5322_s1, %s4386_s23  ;;  %p4393_p11 = scmp.lt.u32.totalorder %s4386_s23, %s5322_s1 }
  0x1e   : > { %p4389_p9 = pnand %p4805_p8, %p4387_p7 }
  0x20   : > { %p4390_p10 = pneg %p4389_p9 }
  0x22   : > { %p4395_p12 = pnand %p4393_p11, %p4390_p10 }
  0x24   : > { %4398 = shalt.err (!%p4395_p12)
}
  0x25   : > { %s4399_s21 = scalar_lea.vmem %s4778_s30, 4608  ;;  %p4407_p5 = scmp.lt.s32.totalorder %s4778_s30, %s4778_s30 }
  0x26   : > { %p4400_p13 = scmp.ne.s32.totalorder %s4778_s30, %s4399_s21  ;;  %p4408_p4 = scmp.lt.s32.totalorder %s4399_s21, %s4399_s21 }
  0x28   : > { %p4402_p0 = pnand %p4400_p13, %p4805_p8  ;;  %p4409_p7 = por %p4408_p4, %p4407_p5 }
  0x2a   : > { %p4403_p2 = pneg %p4402_p0 }
  0x2c   : > { %p4410_p9 = pnand %p4409_p7, %p4403_p2 }
  0x2e   : > { %4413 = shalt.err (!%p4410_p9)
}
  0x2f   : > { %s5306_s22 = smov 128   ;;  %s5308_s13 = smov 8  }
  0x30   : > { %4288 = dma.hbm_to_vmem [thread:$0]  (!%p4789_p6), %s5322_s1, 4608, %s4778_s30, [#allocation12], %s5306_s22, %s5306_s22, %s5308_s13  }
  0x31   : > { %s5324_s5 = sld [smem:[#allocation27_spill]] }
  0x37   : > { %s4414_s21 = scalar_lea.hbm %s5324_s5, 12288 }
  0x38   : > { %p4415_p4 = scmp.ne.s32.totalorder %s5324_s5, %s4414_s21  ;;  %p4421_p12 = scmp.lt.u32.totalorder %s4414_s21, %s5324_s5 }
  0x3a   : > { %p4417_p10 = pnand %p4415_p4, %p4805_p8 }
  0x3c   : > { %p4418_p11 = pneg %p4417_p10 }
  0x3e   : > { %p4423_p13 = pnand %p4421_p12, %p4418_p11 }
  0x40   : > { %4426 = shalt.err (!%p4423_p13)
}
  0x41   : > { %s4427_s30 = scalar_lea.vmem %s4793_s17, 12288  ;;  %p4435_p7 = scmp.lt.s32.totalorder %s4793_s17, %s4793_s17 }
  0x42   : > { %p4428_p0 = scmp.ne.s32.totalorder %s4793_s17, %s4427_s30  ;;  %p4436_p9 = scmp.lt.s32.totalorder %s4427_s30, %s4427_s30 }
  0x44   : > { %p4430_p2 = pnand %p4428_p0, %p4805_p8  ;;  %p4437_p4 = por %p4436_p9, %p4435_p7 }
  0x46   : > { %p4431_p5 = pneg %p4430_p2 }
  0x48   : > { %p4438_p10 = pnand %p4437_p4, %p4431_p5 }
  0x4a   : > { %4441 = shalt.err (!%p4438_p10)
}
  0x4b   : > { %4294 = dma.hbm_to_vmem [thread:$0]  (!%p4789_p6), %s5324_s5, 12288, %s4793_s17, [#allocation15], %s5306_s22, %s5306_s22, %s5308_s13  }
  0x4c   : > { %s4442_s23 = scalar_lea.hbm %s5299_s9, 4096 }
  0x4d   : > { %p4443_p11 = scmp.ne.s32.totalorder %s5299_s9, %s4442_s23  ;;  %p4449_p0 = scmp.lt.u32.totalorder %s4442_s23, %s5299_s9 }
  0x4f   : > { %p4445_p12 = pnand %p4443_p11, %p4805_p8 }
  0x51   : > { %p4446_p13 = pneg %p4445_p12 }
  0x53   : > { %p4451_p2 = pnand %p4449_p0, %p4446_p13 }
  0x55   : > { %4454 = shalt.err (!%p4451_p2)
}
  0x56   : > { %s4455_s17 = scalar_lea.vmem %s4795_s20, 4096  ;;  %p4463_p4 = scmp.lt.s32.totalorder %s4795_s20, %s4795_s20 }
  0x57   : > { %p4456_p5 = scmp.ne.s32.totalorder %s4795_s20, %s4455_s17  ;;  %p4464_p10 = scmp.lt.s32.totalorder %s4455_s17, %s4455_s17 }
  0x59   : > { %p4458_p7 = pnand %p4456_p5, %p4805_p8  ;;  %p4465_p11 = por %p4464_p10, %p4463_p4 }
  0x5b   : > { %p4459_p9 = pneg %p4458_p7 }
  0x5d   : > { %p4466_p12 = pnand %p4465_p11, %p4459_p9 }
  0x5f   : > { %4469 = shalt.err (!%p4466_p12)
}
  0x60   : > { %s4669_s30 = smov 256   ;;  %s4670_s6 = smov 16  }
  0x61   : > { %4300 = dma.hbm_to_vmem [thread:$0]  (!%p4789_p6), %s5299_s9, 4096, %s4795_s20, [#allocation18], %s4669_s30, %s4669_s30, %s4670_s6  }
  0x62   : > { %s4671_s12 = smov [#allocation13]   ;;  %s4672_s24 = smov [#allocation16]  }
  0x63   : > { %s369_s23 = sshll.u32 %s4671_s12, 4  ;;  %s401_s29 = sshll.u32 %s4672_s24, 4  ;;  %s370_s23 = int_to_ptr.vmem [resolvable:$true] %s369_s23  ;;  %s402_s29 = int_to_ptr.vmem [resolvable:$true] %s401_s29 }
  0x64   : > { %s4470_s17 = scalar_lea.hbm %s5293_s3, 12288 }
  0x65   : > { %p4471_p13 = scmp.ne.s32.totalorder %s5293_s3, %s4470_s17  ;;  %p4477_p5 = scmp.lt.u32.totalorder %s4470_s17, %s5293_s3 }
  0x67   : > { %p4473_p0 = pnand %p4471_p13, %p4805_p8 }
  0x69   : > { %p4474_p2 = pneg %p4473_p0 }
  0x6b   : > { %p4479_p7 = pnand %p4477_p5, %p4474_p2 }
  0x6d   : > { %4482 = shalt.err (!%p4479_p7)
}
  0x6e   : > { %s4483_s20 = scalar_lea.vmem %s370_s23, 12288  ;;  %p4491_p11 = scmp.lt.s32.totalorder %s370_s23, %s370_s23 }
  0x6f   : > { %p4484_p9 = scmp.ne.s32.totalorder %s370_s23, %s4483_s20  ;;  %p4492_p12 = scmp.lt.s32.totalorder %s4483_s20, %s4483_s20 }
  0x71   : > { %p4486_p4 = pnand %p4484_p9, %p4805_p8  ;;  %p4493_p1 = por %p4492_p12, %p4491_p11 }
  0x73   : > { %p4487_p10 = pneg %p4486_p4 }
  0x75   : > { %p4494_p3 = pnand %p4493_p1, %p4487_p10 }
  0x77   : > { %4497 = shalt.err (!%p4494_p3)
}
  0x78   : > { %s5325_s22 = smov 8   ;;  %s5326_s13 = smov 128  }
  0x79   : > { %4291 = dma.hbm_to_vmem [thread:$0]  (!%p4789_p6), %s5293_s3, 12288, %s370_s23, [#allocation12], %s5326_s13, %s5326_s13, %s5325_s22  }
  0x7a   : > { %s4498_s8 = scalar_lea.hbm %s5297_s7, 2048 }
  0x7b   : > { %p4499_p1 = scmp.ne.s32.totalorder %s5297_s7, %s4498_s8  ;;  %p4505_p0 = scmp.lt.u32.totalorder %s4498_s8, %s5297_s7 }
  0x7d   : > { %p4501_p3 = pnand %p4499_p1, %p4805_p8 }
  0x7f   : > { %p4502_p13 = pneg %p4501_p3 }
  0x81   : > { %p4507_p2 = pnand %p4505_p0, %p4502_p13 }
  0x83   : > { %4510 = shalt.err (!%p4507_p2)
}
  0x84   : > { %s4511_s21 = scalar_lea.vmem %s402_s29, 2048  ;;  %p4519_p4 = scmp.lt.s32.totalorder %s402_s29, %s402_s29 }
  0x85   : > { %p4512_p5 = scmp.ne.s32.totalorder %s402_s29, %s4511_s21  ;;  %p4520_p10 = scmp.lt.s32.totalorder %s4511_s21, %s4511_s21 }
  0x87   : > { %p4514_p7 = pnand %p4512_p5, %p4805_p8  ;;  %p4521_p11 = por %p4520_p10, %p4519_p4 }
  0x89   : > { %p4515_p9 = pneg %p4514_p7 }
  0x8b   : > { %p4522_p12 = pnand %p4521_p11, %p4515_p9 }
  0x8d   : > { %4525 = shalt.err (!%p4522_p12)
}
  0x8e   : > { %4297 = dma.hbm_to_vmem [thread:$0]  (!%p4789_p6), %s5297_s7, 2048, %s402_s29, [#allocation15], %s5326_s13, %s5326_s13, %s5325_s22  }
  0x8f   : > { %s4673_s20 = smov [#allocation19]   ;;  %s4526_s6 = scalar_lea.hbm %s5301_s11, 12288 }
  0x90   : > { %s433_s1 = sshll.u32 %s4673_s20, 4  ;;  %p4527_p1 = scmp.ne.s32.totalorder %s5301_s11, %s4526_s6  ;;  %s434_s1 = int_to_ptr.vmem [resolvable:$true] %s433_s1 }
  0x91   : > { %p4533_p0 = scmp.lt.u32.totalorder %s4526_s6, %s5301_s11 }
  0x92   : > { %p4529_p3 = pnand %p4527_p1, %p4805_p8 }
  0x94   : > { %p4530_p13 = pneg %p4529_p3 }
  0x96   : > { %p4535_p2 = pnand %p4533_p0, %p4530_p13 }
  0x98   : > { %4538 = shalt.err (!%p4535_p2)
}
  0x99   : > { %s4539_s29 = scalar_lea.vmem %s434_s1, 12288  ;;  %p4547_p4 = scmp.lt.s32.totalorder %s434_s1, %s434_s1 }
  0x9a   : > { %p4540_p5 = scmp.ne.s32.totalorder %s434_s1, %s4539_s29  ;;  %p4548_p10 = scmp.lt.s32.totalorder %s4539_s29, %s4539_s29 }
  0x9c   : > { %p4542_p7 = pnand %p4540_p5, %p4805_p8  ;;  %p4549_p11 = por %p4548_p10, %p4547_p4 }
  0x9e   : > { %p4543_p9 = pneg %p4542_p7 }
  0xa0   : > { %p4550_p12 = pnand %p4549_p11, %p4543_p9 }
  0xa2   : > { %4553 = shalt.err (!%p4550_p12)
}
  0xa3   : > { %s4674_s19 = smov 384   ;;  %s4675_s16 = smov 24  }
  0xa4   : > { %4303 = dma.hbm_to_vmem [thread:$0]  (!%p4789_p6), %s5301_s11, 12288, %s434_s1, [#allocation18], %s4674_s19, %s4674_s19, %s4675_s16  }
  0xa5   : > { %s2843_s17 = sadd.s32 4294967294, %s4662_s28   ;;  %s4940_s20 = sadd.s32 1, %s4662_s28  }
  0xa6   : > { %s36_s5 = ssub.s32 %s4662_s28, %s4940_s20  ;;  %s39_s30 = sadd.s32 1, %s4658_s27 }
  0xa7   : > { %p37_p8 = scmp.eq.s32.totalorder %s36_s5, 0  ;;  %p46_p1 = scmp.ne.s32.totalorder %s4658_s27, %s4654_s26 }
  0xa8   : > { %p47_p3 = scmp.eq.s32.totalorder %s4662_s28, 0  ;;  %p52_p13 = scmp.ne.s32.totalorder %s4654_s26, %s4650_s25 }
  0xa9   : > { %s4951_s6 = scalar_select %p37_p8, %s4658_s27, %s39_s30  }
  0xaa   : > { %p4953_p0 = por %p47_p3, %p46_p1  ;;  %p5328_p2 = scmp.eq.s32.totalorder %s4773_s14, 0 }
  0xab   : > { %p328_p5 = scmp.eq.s32.totalorder %s4773_s14, 1  ;;  %p334_p7 = scmp.eq.s32.totalorder %s2843_s17, 1 }
  0xac   : > { %p4959_p6 = por %p5328_p2, %p52_p13  ;;  %p4318_p9 = scmp.lt.s32.totalorder %s4662_s28, 2 }
  0xad   : > { %s450_s8 = sand.u32 1, %s4658_s27   ;;  %p4966_p4 = por %p328_p5, %p46_p1 }
  0xae   : > { %p4970_p10 = por %p334_p7, %p52_p13  ;;  %s2852_s24 = sshll.u32 %s450_s8, 4 }
  0xaf   : > { %s5330_s10 = scalar_select %p4966_p4, 1, 0 }
  0xb0   : > { %s5331_s12 = scalar_select %p4970_p10, 1, 0 }
  0xb1   : > { %s2885_s29 = sshll.u32 %s4662_s28, 8  ;;  %s454_s23 = scalar_lea.vmem [#allocation8], %s2852_s24 }
  0xb2   : > { %s4978_s21 = scalar_lea.hbm %s5290_s0, %s2885_s29  ;;  %s461_s17 = sshll.u32 %s454_s23, 4  ;;  %s4980_s17 = int_to_ptr.vmem [resolvable:$true] %s461_s17 }
  0xb3   : > { %p4984_p11 = pnand %p4318_p9, %p4953_p0  ;;  %s4988_s30 = scalar_lea.sflag [#allocation9], %s450_s8 }
  0xb4   : > { %s4554_s19 = scalar_lea.hbm %s4978_s21, 256  ;;  %s4559_s18 = scalar_lea.hbm %s5290_s0, 512 }
  0xb5   : > { %p4555_p12 = scmp.ne.s32.totalorder %s4978_s21, %s4554_s19  ;;  %p4556_p8 = pneg %p4984_p11 }
  0xb6   : > { %p4560_p13 = scmp.lt.u32.totalorder %s4978_s21, %s5290_s0  ;;  %p4561_p0 = scmp.lt.u32.totalorder %s4559_s18, %s4554_s19 }
  0xb7   : > { %p4557_p1 = pnand %p4556_p8, %p4555_p12  ;;  %p4563_p5 = scmp.lt.u32.totalorder %s4554_s19, %s4978_s21 }
  0xb8   : > { %p4562_p2 = por %p4561_p0, %p4560_p13 }
  0xb9   : > { %p4558_p3 = pneg %p4557_p1 }
  0xba   : > { %p4564_p7 = por %p4563_p5, %p4562_p2 }
  0xbc   : > { %p4565_p9 = pnand %p4564_p7, %p4558_p3 }
  0xbe   : > { %4568 = shalt.err (!%p4565_p9)
}
  0xbf   : > { %s4569_s8 = scalar_lea.vmem %s4980_s17, 256  ;;  %s4676_s24 = smov [#allocation8]  }
  0xc0   : > { %p4570_p12 = scmp.ne.s32.totalorder %s4980_s17, %s4569_s8  ;;  %s4574_s29 = sshll.u32 %s4676_s24, 4  ;;  %s4575_s29 = int_to_ptr.vmem [resolvable:$false] %s4574_s29 }
  0xc1   : > { %s4576_s16 = scalar_lea.vmem %s4575_s29, 512  ;;  %p4577_p4 = scmp.lt.s32.totalorder %s4980_s17, %s4575_s29 }
  0xc2   : > { %p4572_p1 = pnand %p4570_p12, %p4556_p8  ;;  %p4578_p13 = scmp.lt.s32.totalorder %s4576_s16, %s4569_s8 }
  0xc4   : > { %p4573_p10 = pneg %p4572_p1  ;;  %p4579_p0 = por %p4578_p13, %p4577_p4 }
  0xc6   : > { %p4580_p2 = pnand %p4579_p0, %p4573_p10 }
  0xc8   : > { %4583 = shalt.err (!%p4580_p2)
}
  0xc9   : > { %4307 = dma.hbm_to_vmem [thread:$0]  (!%p4984_p11), %s4978_s21, 256, %s4980_s17, %s4988_s30, %s5326_s13, %s5326_s13, %s5325_s22  }
  0xca   : > { %p5333_p8 = scmp.ne.s32.totalorder %s5320_s15, 0 }
  0xcb   : > { %s5022_s19 = sand.u32 (!%p5333_p8), 1, %s4654_s26  }
  0xcc   : > { %473 = sbr.rel (%p5333_p8) target bundleno = 1804 (0x70c), region = 72  ;;  %s2856_s18 = sshll.u32 (!%p5333_p8), %s5022_s19, 4 }
  0xcd   : > { %s476_s23 = scalar_lea.sflag (!%p5333_p8), [#allocation9], %s5022_s19  ;;  %s5026_s8 = scalar_lea.vmem (!%p5333_p8), [#allocation8], %s2856_s18 }
  0xd3   : > { %4629 = dma.done.wait (%p4959_p6), %s476_s23, 256  }
  0xd4   : > { %4631 = vsyncadd (%p4959_p6), %s476_s23, 4294967040  ;;  %p5334_p4 = scmp.eq.s32.totalorder %s4773_s14, 0 }
  0xd6   : > { %4633 = dma.done.wait (%p5334_p4), [#allocation12], 16896   ;;  %p5335_p10 = pmov %p5334_p4 }
  0xd7   : > { %p5336_p11 = pmov %p5334_p4 }
  0xd8   : > { %4635 = vsyncadd (%p5335_p10), [#allocation12], 4294950400 }
  0xd9   : > { %4637 = dma.done.wait (%p5336_p11), [#allocation15], 14336   ;;  %p5337_p3 = pmov %p5334_p4 }
  0xdb   : > { %4639 = vsyncadd (%p5337_p3), [#allocation15], 4294952960  ;;  %p5338_p5 = pmov %p5337_p3 }
  0xdc   : > { %p5339_p7 = pmov %p5337_p3 }
  0xdd   : > { %4641 = dma.done.wait (%p5338_p5), [#allocation18], 16384  }
  0xde   : > { %4643 = vsyncadd (%p5339_p7), [#allocation18], 4294950912  ;;  %vm548_vm0 = vcmask 385024   ;;  %v4677_v0 = vmov 0.0   ;;  %v572_v1 = vld [vmem:[#allocation11 + $0x30] sm:$0xff]  ;;  %v573_v2 = vld [vmem:[#allocation11 + $0x38] sm:$0xff] }
  0xdf   : > { %549 = vst.msk [vmem:[#allocation2] sm:$0x1] %vm548_vm0, %v4677_v0  ;;  %550 = vst.msk [vmem:[#allocation2 + $0x11] sm:$0x1] %vm548_vm0, %v4677_v0  ;;  %v556_v3 = vld [vmem:[#allocation11] sm:$0xff]  ;;  %v3735_v4 = vpack.c.bf16 %v573_v2, %v572_v1  ;;  %v557_v5 = vld [vmem:[#allocation11 + $0x8] sm:$0xff] }
  0xe0   : > { %1099 = vst [vmem:[#allocation4] sm:$0x1] %v4677_v0  ;;  %1100 = vst [vmem:[#allocation4 + $0x9] sm:$0x1] %v4677_v0  ;;  %v574_v6 = vld [vmem:[#allocation11 + $0x40] sm:$0xff]  ;;  %v575_v7 = vld [vmem:[#allocation11 + $0x48] sm:$0xff]  ;;  %v3747_v8 = vpack.c.bf16 %v557_v5, %v556_v3 }
  0xe1   : > { %1648 = vst [vmem:[#allocation6] sm:$0x1] %v4677_v0  ;;  %1649 = vst [vmem:[#allocation6 + $0x5] sm:$0x1] %v4677_v0  ;;  %v3739_v9 = vpack.c.bf16 %v575_v7, %v574_v6  ;;  %v558_v10 = vld [vmem:[#allocation11 + $0x10] sm:$0xff]  ;;  %v559_v11 = vld [vmem:[#allocation11 + $0x18] sm:$0xff]  ;;  %3736 = vmatprep.subr.bf16.mxu1 %v3735_v4 }
  0xe2   : > { %v576_v12 = vld [vmem:[#allocation11 + $0x50] sm:$0xff]  ;;  %vm551_vm1 = vcmask 392192   ;;  %v3751_v13 = vpack.c.bf16 %v559_v11, %v558_v10  ;;  %v577_v14 = vld [vmem:[#allocation11 + $0x58] sm:$0xff]  ;;  %v560_v15 = vld [vmem:[#allocation11 + $0x20] sm:$0xff]  ;;  %3748 = vmatprep.subr.bf16.mxu0 %v3747_v8  ;;  %3738 = vmatpush3.bf16.msra.mxu1 %v3735_v4  ;;  %v4678_v3 = vmov 0.0|0.0   ;;  %vm4679_vm2 = vmmov 0  }
  0xe3   : > { %v561_v16 = vld [vmem:[#allocation11 + $0x28] sm:$0xff]  ;;  %v546_v17 = vld [vmem:[%s5026_s8] sm:$0xff]  ;;  %3750 = vmatpush3.bf16.msra.mxu0 %v3747_v8  ;;  %3740 = vmatprep.subr.bf16.mxu1 %v3739_v9  ;;  %v3743_v19 = vpack.c.bf16 %v577_v14, %v576_v12  ;;  %v744_v27 = vld [vmem:[#allocation11 + $0xd8] sm:$0xff]  ;;  %s5340_s16 = sld [smem:[#allocation28_spill]]  ;;  %s5341_s22 = sld [smem:[#allocation29_spill]] }
  0xe4   : > { %v547_v18 = vld [vmem:[%s5026_s8 + $0x8] sm:$0xff]  ;;  %552 = vst.msk [vmem:[#allocation2 + $0x1] sm:$0xff] %vm551_vm1, %v546_v17  ;;  %3752 = vmatprep.subr.bf16.mxu0 %v3751_v13  ;;  %v3755_v20 = vpack.c.bf16 %v561_v16, %v560_v15  ;;  %v741_v21 = vld [vmem:[#allocation11 + $0xc0] sm:$0xff]  ;;  %v743_v26 = vld [vmem:[#allocation11 + $0xd0] sm:$0xff]  ;;  %s5342_s21 = sld [smem:[#allocation30_spill]]  ;;  %s5343_s30 = sld [smem:[#allocation31_spill]] }
  0xe5   : > { %553 = vst.msk [vmem:[#allocation2 + $0x9] sm:$0xff] %vm551_vm1, %v547_v18  ;;  %v742_v22 = vld [vmem:[#allocation11 + $0xc8] sm:$0xff]  ;;  %v900_v23 = vld [vmem:[#allocation11 + $0x60] sm:$0xff]  ;;  %v902_v29 = vld [vmem:[#allocation11 + $0x70] sm:$0xff]  ;;  %v3763_v35 = vpack.c.bf16 %v744_v27, %v743_v26  ;;  %s4255_s24 = smul.u32 6, %s5022_s19  ;;  %s2702_s1 = scalar_lea.sflag [#allocation10], %s5022_s19 }
  0xe6   : > { %3742 = vmatpush3.bf16.msra.mxu1 %v3739_v9  ;;  %v901_v24 = vld [vmem:[#allocation11 + $0x68] sm:$0xff]  ;;  %v3759_v25 = vpack.c.bf16 %v742_v22, %v741_v21  ;;  %v903_v30 = vld [vmem:[#allocation11 + $0x78] sm:$0xff]  ;;  %v745_v37 = vld [vmem:[#allocation11 + $0xe0] sm:$0xff]  ;;  %s4256_s29 = smul.u32 96, %s4773_s14  ;;  %p5345_p9 = scmp.ne.s32.totalorder %s5330_s10, 0 }
  0xe7   : > { %3754 = vmatpush3.bf16.msra.mxu0 %v3751_v13  ;;  %3744 = vmatprep.subr.bf16.mxu1 %v3743_v19  ;;  %v3783_v28 = vpack.c.bf16 %v901_v24, %v900_v23  ;;  %v3787_v36 = vpack.c.bf16 %v903_v30, %v902_v29  ;;  %v746_v38 = vld [vmem:[#allocation11 + $0xe8] sm:$0xff]  ;;  %v904_v39 = vld [vmem:[#allocation11 + $0x80] sm:$0xff]  ;;  %v563_v44 = vld [vmem:[#allocation11 + $0x90] sm:$0xff]  ;;  %s545_s18 = scalar_lea.vmem [#allocation20], %s4255_s24  ;;  %s4681_s14 = smov [#allocation20]  }
  0xe8   : > { %3756 = vmatprep.subr.bf16.mxu0 %v3755_v20  ;;  %v905_v40 = vld [vmem:[#allocation11 + $0x88] sm:$0xff]  ;;  %v3767_v42 = vpack.c.bf16 %v746_v38, %v745_v37  ;;  %v564_v45 = vld [vmem:[#allocation11 + $0x98] sm:$0xff]  ;;  %v565_v47 = vld [vmem:[#allocation11 + $0xa0] sm:$0xff]  ;;  %s2716_s23 = sshll.u32 %s545_s18, 4  ;;  %s4588_s17 = sshll.u32 %s4681_s14, 4  ;;  %s5248_s23 = int_to_ptr.vmem [resolvable:$true] %s2716_s23  ;;  %s4589_s17 = int_to_ptr.vmem [resolvable:$false] %s4588_s17 }
  0xe9   : > { %v3791_v43 = vpack.c.bf16 %v905_v40, %v904_v39  ;;  %v3771_v46 = vpack.c.bf16 %v564_v45, %v563_v44  ;;  %v566_v48 = vld [vmem:[#allocation11 + $0xa8] sm:$0xff]  ;;  %v567_v51 = vld [vmem:[#allocation11 + $0xb0] sm:$0xff]  ;;  %v568_v52 = vld [vmem:[#allocation11 + $0xb8] sm:$0xff]  ;;  %s4590_s5 = scalar_lea.vmem %s4589_s17, 192  ;;  %p4591_p13 = scmp.lt.s32.totalorder %s5248_s23, %s4589_s17 }
  0xea   : > { %3746 = vmatpush3.bf16.msra.mxu1 %v3743_v19  ;;  %v3775_v50 = vpack.c.bf16 %v566_v48, %v565_v47  ;;  %v3779_v53 = vpack.c.bf16 %v568_v52, %v567_v51  ;;  %v990_v54 = vld [vmem:[#allocation11 + $0xf0] sm:$0xff]  ;;  %v991_v55 = vld [vmem:[#allocation11 + $0xf8] sm:$0xff]  ;;  %v992_v57 = vld [vmem:[#allocation11 + $0x100] sm:$0xff] }
  0xeb   : > { %v569_v31 = vld [vmem:[#allocation2 + $0x1] sm:$0xff]  ;;  %3758 = vmatpush3.bf16.msra.mxu0 %v3755_v20  ;;  %3760 = vmatprep.subr.bf16.mxu1 %v3759_v25  ;;  %v3795_v56 = vpack.c.bf16 %v991_v55, %v990_v54  ;;  %v993_v58 = vld [vmem:[#allocation11 + $0x108] sm:$0xff]  ;;  %v1138_v63 = vld [vmem:[#allocation13 + $0x80] sm:$0xff] }
  0xec   : > { %v570_v32 = vld [vmem:[#allocation2 + $0x9] sm:$0xff]  ;;  %v554_v33 = vld [vmem:[#allocation2] sm:$0xff]  ;;  %3202 = vmatprep.mubr.msk.f32.mxu1 %vm551_vm1, %v569_v31  ;;  %3784 = vmatprep.subr.bf16.mxu0 %v3783_v28  ;;  %v3799_v59 = vpack.c.bf16 %v993_v58, %v992_v57  ;;  %v1139_v1 = vld [vmem:[#allocation13 + $0x88] sm:$0xff] }
  0xed   : > { %v555_v34 = vld [vmem:[#allocation2 + $0x8] sm:$0xff]  ;;  %3217 = vmatprep.mubr.msk.f32.mxu0 %vm551_vm1, %v554_v33  ;;  %3203 = vmatmul.mubr.msk.f32.vlgmr.msra.gmra.mrb[0].mxu1 %vm551_vm1, %v570_v32  ;;  %v994_v60 = vld [vmem:[#allocation11 + $0x110] sm:$0xff]  ;;  %v3808_v4 = vpack.c.bf16 %v1139_v1, %v1138_v63  ;;  %v1104_v5 = vld [vmem:[#allocation13 + $0x8] sm:$0xff] }
  0xee   : > { %v897_v41 = vld [vmem:[#allocation2 + $0x2] sm:$0xff]  ;;  %3218 = vmatmul.mubr.msk.f32.vlgmr.msra.gmra.mrb[0].mxu0 %vm551_vm1, %v555_v34  ;;  %3762 = vmatpush3.bf16.msra.mxu1 %v3759_v25  ;;  %v898_v49 = vld [vmem:[#allocation2 + $0xa] sm:$0xff]  ;;  %v1143_v14 = vld [vmem:[#allocation13 + $0xa8] sm:$0xff] }
  0xef   : > { %3786 = vmatpush3.bf16.msra.mxu0 %v3783_v28  ;;  %3764 = vmatprep.subr.bf16.mxu1 %v3763_v35  ;;  %v995_v61 = vld [vmem:[#allocation11 + $0x118] sm:$0xff]  ;;  %v1103_v2 = vld [vmem:[#allocation13] sm:$0xff]  ;;  %v1140_v6 = vld [vmem:[#allocation13 + $0x90] sm:$0xff] }
  0xf0   : > { %3788 = vmatprep.subr.bf16.mxu0 %v3787_v36  ;;  %3262 = vmatprep.mubr.msk.f32.mxu0 %vm551_vm1, %v897_v41  ;;  %v3803_v62 = vpack.c.bf16 %v995_v61, %v994_v60  ;;  %v1141_v7 = vld [vmem:[#allocation13 + $0x98] sm:$0xff]  ;;  %v3832_v8 = vpack.c.bf16 %v1104_v5, %v1103_v2  ;;  %v1105_v9 = vld [vmem:[#allocation13 + $0x10] sm:$0xff]  ;;  %v1142_v13 = vld [vmem:[#allocation13 + $0xa0] sm:$0xff] }
  0xf1   : > { %3232 = vmatprep.mubr.msk.f32.mxu1 %vm551_vm1, %v569_v31  ;;  %v1106_v10 = vld [vmem:[#allocation13 + $0x18] sm:$0xff]  ;;  %v3811_v11 = vpack.c.bf16 %v1141_v7, %v1140_v6  ;;  %v3814_v15 = vpack.c.bf16 %v1143_v14, %v1142_v13  ;;  %v1144_v16 = vld [vmem:[#allocation13 + $0xb0] sm:$0xff]  ;;  %v1107_v19 = vld [vmem:[#allocation13 + $0x20] sm:$0xff] }
  0xf2   : > { %3766 = vmatpush3.bf16.msra.mxu1 %v3763_v35  ;;  %v3835_v12 = vpack.c.bf16 %v1106_v10, %v1105_v9  ;;  %v1145_v17 = vld [vmem:[#allocation13 + $0xb8] sm:$0xff]  ;;  %v1108_v20 = vld [vmem:[#allocation13 + $0x28] sm:$0xff]  ;;  %v1146_v22 = vld [vmem:[#allocation13 + $0xc0] sm:$0xff] }
  0xf3   : > { %3790 = vmatpush3.bf16.msra.mxu0 %v3787_v36  ;;  %3768 = vmatprep.subr.bf16.mxu1 %v3767_v42  ;;  %v3817_v18 = vpack.c.bf16 %v1145_v17, %v1144_v16  ;;  %v3838_v21 = vpack.c.bf16 %v1108_v20, %v1107_v19  ;;  %v1147_v23 = vld [vmem:[#allocation13 + $0xc8] sm:$0xff]  ;;  %v1109_v25 = vld [vmem:[#allocation13 + $0x30] sm:$0xff]  ;;  %v1110_v26 = vld [vmem:[#allocation13 + $0x38] sm:$0xff] }
  0xf4   : > { %3792 = vmatprep.subr.bf16.mxu0 %v3791_v43  ;;  %v3820_v24 = vpack.c.bf16 %v1147_v23, %v1146_v22  ;;  %v1148_v27 = vld [vmem:[#allocation13 + $0xd0] sm:$0xff]  ;;  %v3841_v28 = vpack.c.bf16 %v1110_v26, %v1109_v25  ;;  %v1149_v29 = vld [vmem:[#allocation13 + $0xd8] sm:$0xff]  ;;  %v1111_v31 = vld [vmem:[#allocation13 + $0x40] sm:$0xff] }
  0xf5   : > { %v3823_v30 = vpack.c.bf16 %v1149_v29, %v1148_v27  ;;  %v1151_v35 = vld [vmem:[#allocation13 + $0xe8] sm:$0xff]  ;;  %v1113_v37 = vld [vmem:[#allocation13 + $0x50] sm:$0xff]  ;;  %v1114_v38 = vld [vmem:[#allocation13 + $0x58] sm:$0xff] }
  0xf6   : > { %3770 = vmatpush3.bf16.msra.mxu1 %v3767_v42  ;;  %v1152_v39 = vld [vmem:[#allocation13 + $0xf0] sm:$0xff]  ;;  %v3847_v40 = vpack.c.bf16 %v1114_v38, %v1113_v37  ;;  %v1116_v44 = vld [vmem:[#allocation13 + $0x68] sm:$0xff]  ;;  %v1118_v47 = vld [vmem:[#allocation13 + $0x78] sm:$0xff] }
  0xf7   : > { %3794 = vmatpush3.bf16.msra.mxu0 %v3791_v43  ;;  %3772 = vmatprep.subr.bf16.mxu1 %v3771_v46  ;;  %v1115_v43 = vld [vmem:[#allocation13 + $0x60] sm:$0xff]  ;;  %v2875_v55 = vld [vmem:[%s5292_s2] ss:$0 sm:$0xff]  ;;  %v1298_v14 = vld [vmem:[#allocation13 + $0x218] sm:$0xff] }
  0xf8   : > { %3807 = vmatprep.subr.bf16.mxu0 %v4678_v3  ;;  %v3850_v45 = vpack.c.bf16 %v1116_v44, %v1115_v43  ;;  %v1295_v7 = vld [vmem:[#allocation13 + $0x200] sm:$0xff]  ;;  %v1297_v13 = vld [vmem:[#allocation13 + $0x210] sm:$0xff]  ;;  %v1121_v17 = vld [vmem:[#allocation13 + $0x188] sm:$0xff] }
  0xf9   : > { %3233 = vmatmul.mubr.msk.f32.vlgmr.msra.gmra.mrb[2].mxu1 %vm551_vm1, %v570_v32  ;;  %v1112_v32 = vld [vmem:[#allocation13 + $0x48] sm:$0xff]  ;;  %v3859_v16 = vpack.c.bf16 %v1298_v14, %v1297_v13  ;;  %v1123_v23 = vld [vmem:[#allocation13 + $0x198] sm:$0xff]  ;;  %v1305_v37 = vld [vmem:[#allocation13 + $0x250] sm:$0xff] }
  0xfa   : > { %3263 = vmatmul.mubr.msk.f32.vlgmr.msra.gmra.mrb[0].mxu0 %vm551_vm1, %v898_v49  ;;  %3774 = vmatpush3.bf16.msra.mxu1 %v3771_v46  ;;  %v1117_v46 = vld [vmem:[#allocation13 + $0x70] sm:$0xff]  ;;  %v1300_v19 = vld [vmem:[#allocation13 + $0x228] sm:$0xff]  ;;  %v1302_v25 = vld [vmem:[#allocation13 + $0x238] sm:$0xff] }
  0xfb   : > { %3776 = vmatprep.subr.bf16.mxu1 %v3775_v50  ;;  %3247 = vmatprep.mubr.msk.f32.mxu1 %vm551_vm1, %v554_v33  ;;  %v1150_v33 = vld [vmem:[#allocation13 + $0xe0] sm:$0xff]  ;;  %v3853_v48 = vpack.c.bf16 %v1118_v47, %v1117_v46  ;;  %v1306_v38 = vld [vmem:[#allocation13 + $0x258] sm:$0xff]  ;;  %v1308_v44 = vld [vmem:[#allocation13 + $0x268] sm:$0xff] }
  0xfc   : > { %3809 = vmatpush3.bf16.msra.mxu0 %v3808_v4  ;;  %v3826_v36 = vpack.c.bf16 %v1151_v35, %v1150_v33  ;;  %3312 = vmatprep.mubr.msk.f32.mxu0 %vm4679_vm2, %v4677_v0  ;;  %v1307_v43 = vld [vmem:[#allocation13 + $0x260] sm:$0xff]  ;;  %v1130_v46 = vld [vmem:[#allocation13 + $0x1d0] sm:$0xff] }
  0xfd   : > { %3810 = vmatprep.subr.bf16.mxu0 %v4678_v3  ;;  %v3874_v47 = vpack.c.bf16 %v1308_v44, %v1307_v43  ;;  %v1545_v14 = vld [vmem:[#allocation13 + $0x2a0] sm:$0xff]  ;;  %v1556_v43 = vld [vmem:[#allocation13 + $0x2f8] sm:$0xff] }
  0xfe   : > { %3778 = vmatpush3.bf16.msra.mxu1 %v3775_v50 }
  0xff   : > { %3780 = vmatprep.subr.bf16.mxu1 %v3779_v53 }
 0x100   : > { %3812 = vmatpush3.bf16.msra.mxu0 %v3811_v11 }
 0x101   : > { %3813 = vmatprep.subr.bf16.mxu0 %v4678_v3 }
 0x102   : > { %3782 = vmatpush3.bf16.msra.mxu1 %v3779_v53 }
 0x103   : > { %3796 = vmatprep.subr.bf16.mxu1 %v3795_v56 }
 0x104   : > { %3815 = vmatpush3.bf16.msra.mxu0 %v3814_v15  ;;  %v1120_v15 = vld [vmem:[#allocation13 + $0x180] sm:$0xff] }
 0x105   : > { %3248 = vmatmul.mubr.msk.f32.vlgmr.msra.gmra.mrb[2].mxu1 %vm551_vm1, %v555_v34  ;;  %3816 = vmatprep.subr.bf16.mxu0 %v4678_v3  ;;  %v3844_v34 = vpack.c.bf16 %v1112_v32, %v1111_v31  ;;  %v3880_v20 = vpack.c.bf16 %v1121_v17, %v1120_v15  ;;  %v1303_v31 = vld [vmem:[#allocation13 + $0x240] sm:$0xff]  ;;  %v1304_v32 = vld [vmem:[#allocation13 + $0x248] sm:$0xff] }
 0x106   : > { %3798 = vmatpush3.bf16.msra.mxu1 %v3795_v56  ;;  %3277 = vmatprep.mubr.msk.f32.mxu1 %vm551_vm1, %v897_v41  ;;  %v1153_v41 = vld [vmem:[#allocation13 + $0xf8] sm:$0xff]  ;;  %v2876_v56 = vld [vmem:[%s5292_s2 + $0x1] ss:$0 sm:$0xff]  ;;  %v3868_v35 = vpack.c.bf16 %v1304_v32, %v1303_v31  ;;  %v1461_v17 = vld [vmem:[#allocation13 + $0x140] sm:$0xff] }
 0x107   : > { %3800 = vmatprep.subr.bf16.mxu1 %v3799_v59  ;;  %v3829_v42 = vpack.c.bf16 %v1153_v41, %v1152_v39  ;;  %v3871_v41 = vpack.c.bf16 %v1306_v38, %v1305_v37  ;;  %v1551_v32 = vld [vmem:[#allocation13 + $0x2d0] sm:$0xff] }
 0x108   : > { %3818 = vmatpush3.bf16.msra.mxu0 %v3817_v18  ;;  %v1299_v18 = vld [vmem:[#allocation13 + $0x220] sm:$0xff] }
 0x109   : > { %3819 = vmatprep.subr.bf16.mxu0 %v4678_v3  ;;  %v3862_v22 = vpack.c.bf16 %v1300_v19, %v1299_v18  ;;  %v1462_v18 = vld [vmem:[#allocation13 + $0x148] sm:$0xff] }
 0x10a   : > { %3802 = vmatpush3.bf16.msra.mxu1 %v3799_v59 }
 0x10b   : > { %3804 = vmatprep.subr.bf16.mxu1 %v3803_v62 }
 0x10c   : > { %3821 = vmatpush3.bf16.msra.mxu0 %v3820_v24  ;;  %v1301_v24 = vld [vmem:[#allocation13 + $0x230] sm:$0xff] }
 0x10d   : > { %3822 = vmatprep.subr.bf16.mxu0 %v4678_v3  ;;  %v3865_v29 = vpack.c.bf16 %v1302_v25, %v1301_v24  ;;  %v1464_v24 = vld [vmem:[#allocation13 + $0x158] sm:$0xff] }
 0x10e   : > { %3806 = vmatpush3.bf16.msra.mxu1 %v3803_v62 }
 0x10f   : > { %3831 = vmatprep.subr.bf16.mxu1 %v4678_v3 }
 0x110   : > { %3824 = vmatpush3.bf16.msra.mxu0 %v3823_v30  ;;  %v1125_v30 = vld [vmem:[#allocation13 + $0x1a8] sm:$0xff] }
 0x111   : > { %3278 = vmatmul.mubr.msk.f32.vlgmr.msra.gmra.mrb[2].mxu1 %vm551_vm1, %v898_v49  ;;  %3825 = vmatprep.subr.bf16.mxu0 %v4678_v3 }
 0x112   : > { %3833 = vmatpush3.bf16.msra.mxu1 %v3832_v8  ;;  %3347 = vmatprep.mubr.msk.f32.mxu1 %vm4679_vm2, %v4677_v0  ;;  %v1296_v8 = vld [vmem:[#allocation13 + $0x208] sm:$0xff] }
 0x113   : > { %3834 = vmatprep.subr.bf16.mxu1 %v4678_v3  ;;  %v3856_v11 = vpack.c.bf16 %v1296_v8, %v1295_v7  ;;  %v1543_v8 = vld [vmem:[#allocation13 + $0x290] sm:$0xff] }
 0x114   : > { %3827 = vmatpush3.bf16.msra.mxu0 %v3826_v36  ;;  %v1127_v36 = vld [vmem:[#allocation13 + $0x1b8] sm:$0xff] }
 0x115   : > { %3828 = vmatprep.subr.bf16.mxu0 %v4678_v3 }
 0x116   : > { %3836 = vmatpush3.bf16.msra.mxu1 %v3835_v12 }
 0x117   : > { %3837 = vmatprep.subr.bf16.mxu1 %v4678_v3 }
 0x118   : > { %3830 = vmatpush3.bf16.msra.mxu0 %v3829_v42  ;;  %v1129_v42 = vld [vmem:[#allocation13 + $0x1c8] sm:$0xff] }
 0x119   : > { %3855 = vmatprep.subr.bf16.mxu0 %v4678_v3 }
 0x11a   : > { %3839 = vmatpush3.bf16.msra.mxu1 %v3838_v21  ;;  %v1122_v21 = vld [vmem:[#allocation13 + $0x190] sm:$0xff] }
 0x11b   : > { %3840 = vmatprep.subr.bf16.mxu1 %v4678_v3  ;;  %v3883_v27 = vpack.c.bf16 %v1123_v23, %v1122_v21  ;;  %v3916_v21 = vpack.c.bf16 %v1462_v18, %v1461_v17  ;;  %v1463_v23 = vld [vmem:[#allocation13 + $0x150] sm:$0xff]  ;;  %v1663_v17 = vld [vmem:[#allocation14 + $0x58] sm:$0xff] }
 0x11e   : > { %3842 = vmatpush3.bf16.msra.mxu1 %v3841_v28  ;;  %v1124_v28 = vld [vmem:[#allocation13 + $0x1a0] sm:$0xff] }
 0x11f   : > { %3843 = vmatprep.subr.bf16.mxu1 %v4678_v3  ;;  %v3886_v33 = vpack.c.bf16 %v1125_v30, %v1124_v28  ;;  %v1550_v28 = vld [vmem:[#allocation13 + $0x2c8] sm:$0xff] }
 0x120   : > { %v1466_v30 = vld [vmem:[#allocation13 + $0x168] sm:$0xff] }
 0x122   : > { %3845 = vmatpush3.bf16.msra.mxu1 %v3844_v34  ;;  %v1126_v34 = vld [vmem:[#allocation13 + $0x1b0] sm:$0xff] }
 0x123   : > { %3846 = vmatprep.subr.bf16.mxu1 %v4678_v3  ;;  %v3889_v39 = vpack.c.bf16 %v1127_v36, %v1126_v34  ;;  %v1552_v34 = vld [vmem:[#allocation13 + $0x2d8] sm:$0xff] }
 0x124   : > { %v1468_v36 = vld [vmem:[#allocation13 + $0x178] sm:$0xff]  ;;  %v3943_v37 = vpack.c.bf16 %v1552_v34, %v1551_v32 }
 0x126   : > { %3848 = vmatpush3.bf16.msra.mxu1 %v3847_v40  ;;  %v1128_v40 = vld [vmem:[#allocation13 + $0x1c0] sm:$0xff] }
 0x127   : > { %3849 = vmatprep.subr.bf16.mxu1 %v4678_v3 }
 0x12a   : > { %3851 = vmatpush3.bf16.msra.mxu1 %v3850_v45  ;;  %v3892_v45 = vpack.c.bf16 %v1129_v42, %v1128_v40  ;;  %v1554_v40 = vld [vmem:[#allocation13 + $0x2e8] sm:$0xff]  ;;  %v1555_v42 = vld [vmem:[#allocation13 + $0x2f0] sm:$0xff] }
 0x12b   : > { %3852 = vmatprep.subr.bf16.mxu1 %v4678_v3 }
 0x12e   : > { %3854 = vmatpush3.bf16.msra.mxu1 %v3853_v48  ;;  %v1131_v48 = vld [vmem:[#allocation13 + $0x1d8] sm:$0xff] }
 0x12f   : > { %3879 = vmatprep.subr.bf16.mxu1 %v4678_v3 }
 0x1c0   : > { %v3204_v49 = vpop.f32.mrb[0].mxu1 }
 0x1c1   : > { %v650_v50 = vpop.f32.mrb[1].mxu1 }
 0x1cd   : > { %v3264_v51 = vpop.f32.mrb[0].mxu0 }
 0x1ce   : > { %v4247_v52 = vadd.f32 %v3264_v51, %v3204_v49  ;;  %v978_v53 = vpop.f32.mrb[1].mxu0  ;;  %v1309_v49 = vld [vmem:[#allocation13 + $0x270] sm:$0xff]  ;;  %v3895_v51 = vpack.c.bf16 %v1131_v48, %v1130_v46  ;;  %v1687_v46 = vld [vmem:[#allocation14 + $0x80] sm:$0xff] }
 0x1cf   : > { %v4248_v54 = vadd.f32 %v978_v53, %v650_v50  ;;  %v1310_v50 = vld [vmem:[#allocation13 + $0x278] sm:$0xff]  ;;  %v1652_v48 = vld [vmem:[#allocation14] sm:$0xff] }
 0x1d0   : > { %v1079_v57 = vadd.f32 %v4247_v52, %v2875_v55  ;;  %v1132_v52 = vld [vmem:[#allocation13 + $0x1e0] sm:$0xff]  ;;  %v3877_v53 = vpack.c.bf16 %v1310_v50, %v1309_v49  ;;  %v1653_v50 = vld [vmem:[#allocation14 + $0x8] sm:$0xff] }
 0x1d1   : > { %v1078_v58 = vadd.f32 %v4248_v54, %v2875_v55  ;;  %v1133_v54 = vld [vmem:[#allocation13 + $0x1e8] sm:$0xff]  ;;  %v1453_v55 = vld [vmem:[#allocation13 + $0x100] sm:$0xff] }
 0x1d2   : > { %v1081_v63 = vmax.f32 %v1079_v57, 0.0  ;;  %v3898_v57 = vpack.c.bf16 %v1133_v54, %v1132_v52  ;;  %v1690_v52 = vld [vmem:[#allocation14 + $0x98] sm:$0xff]  ;;  %v1654_v54 = vld [vmem:[#allocation14 + $0x10] sm:$0xff] }
 0x1d3   : > { %v1080_v2 = vmax.f32 %v1078_v58, 0.0  ;;  %v1134_v58 = vld [vmem:[#allocation13 + $0x1f0] sm:$0xff] }
 0x1e4   : > { %v3279_v59 = vpop.f32.mrb[2].mxu1 }
 0x1e5   : > { %v1088_v60 = vadd.f32 %v3279_v59, %v2876_v56  ;;  %v1062_v61 = vpop.f32.mrb[3].mxu1 }
 0x1e6   : > { %v1087_v62 = vadd.f32 %v2876_v56, %v1062_v61  ;;  %v1454_v56 = vld [vmem:[#allocation13 + $0x108] sm:$0xff]  ;;  %v1455_v61 = vld [vmem:[#allocation13 + $0x110] sm:$0xff] }
 0x1e7   : > { %v1090_v1 = vmax.f32 %v1088_v60, 0.0  ;;  %v3904_v59 = vpack.c.bf16 %v1454_v56, %v1453_v55  ;;  %v1135_v60 = vld [vmem:[#allocation13 + $0x1f8] sm:$0xff] }
 0x1e8   : > { %v1089_v4 = vmax.f32 %v1087_v62, 0.0  ;;  %v1456_v62 = vld [vmem:[#allocation13 + $0x118] sm:$0xff] }
 0x1e9   : > { %v1092_v5 = vmax.f32 %v1081_v63, %v1090_v1  ;;  %v3901_v63 = vpack.c.bf16 %v1135_v60, %v1134_v58  ;;  %v1541_v1 = vld [vmem:[#allocation13 + $0x280] sm:$0xff]  ;;  %v1655_v55 = vld [vmem:[#allocation14 + $0x18] sm:$0xff] }
 0x1ea   : > { %v1091_v6 = vmax.f32 %v1080_v2, %v1089_v4  ;;  %v3907_v2 = vpack.c.bf16 %v1456_v62, %v1455_v61  ;;  %v1542_v4 = vld [vmem:[#allocation13 + $0x288] sm:$0xff]  ;;  %v1691_v58 = vld [vmem:[#allocation14 + $0xa0] sm:$0xff] }
 0x1eb   : > { %1094 = vst [vmem:[#allocation3 + $0x8] sm:$0xff] %v1092_v5  ;;  %v1457_v5 = vld [vmem:[#allocation13 + $0x120] sm:$0xff]  ;;  %v3928_v7 = vpack.c.bf16 %v1542_v4, %v1541_v1  ;;  %v1657_v62 = vld [vmem:[#allocation14 + $0x28] sm:$0xff]  ;;  %v1693_v1 = vld [vmem:[#allocation14 + $0xb0] sm:$0xff] }
 0x1ec   : > { %1093 = vst [vmem:[#allocation3] sm:$0xff] %v1091_v6  ;;  %v1458_v6 = vld [vmem:[#allocation13 + $0x128] sm:$0xff]  ;;  %v1656_v60 = vld [vmem:[#allocation14 + $0x20] sm:$0xff]  ;;  %v1658_v4 = vld [vmem:[#allocation14 + $0x30] sm:$0xff] }
 0x1f3   : > { %v1095_v9 = vld [vmem:[#allocation3] ss:$2 sm:$0xff]  ;;  %v1097_v10 = vld [vmem:[#allocation3 + $0x1] ss:$2 sm:$0xff] }
 0x1f4   : > { %v5094_v12 = vmax.f32 %v1095_v9, %v1097_v10  ;;  %v3910_v9 = vpack.c.bf16 %v1458_v6, %v1457_v5  ;;  %v1544_v10 = vld [vmem:[#allocation13 + $0x298] sm:$0xff] }
 0x1f5   : > { %v3931_v13 = vpack.c.bf16 %v1544_v10, %v1543_v8  ;;  %v1659_v6 = vld [vmem:[#allocation14 + $0x38] sm:$0xff]  ;;  %v1695_v8 = vld [vmem:[#allocation14 + $0xc0] sm:$0xff] }
 0x1f6   : > { %1101 = vst [vmem:[#allocation4 + $0x1] sm:$0xff] %v5094_v12  ;;  %3313 = vmatmul.mubr.f32.vlgmr.msra.gmra.mrb[2].mxu0 %v5094_v12  ;;  %v1660_v10 = vld [vmem:[#allocation14 + $0x40] sm:$0xff] }
 0x1f7   : > { %3857 = vmatpush3.bf16.msra.mxu0 %v3856_v11  ;;  %3382 = vmatprep.mubr.msk.f32.mxu0 %vm4679_vm2, %v4677_v0  ;;  %v1459_v11 = vld [vmem:[#allocation13 + $0x130] sm:$0xff] }
 0x1f8   : > { %3858 = vmatprep.subr.bf16.mxu0 %v4678_v3 }
 0x1fb   : > { %3860 = vmatpush3.bf16.msra.mxu0 %v3859_v16  ;;  %v1546_v16 = vld [vmem:[#allocation13 + $0x2a8] sm:$0xff] }
 0x1fc   : > { %3861 = vmatprep.subr.bf16.mxu0 %v4678_v3  ;;  %v3934_v19 = vpack.c.bf16 %v1546_v16, %v1545_v14  ;;  %v1698_v14 = vld [vmem:[#allocation14 + $0xd8] sm:$0xff]  ;;  %v1662_v16 = vld [vmem:[#allocation14 + $0x50] sm:$0xff] }
 0x1fd   : > { %v5102_v26 = vld [vmem:[#allocation4] sm:$0xff] }
 0x1fe   : > { %3348 = vmatmul.mubr.f32.vlgmr.msra.gmra.mrb[4].mxu1 %v5102_v26  ;;  %v1451_v44 = vld [vmem:[#allocation4 + $0x2] sm:$0xff] }
 0x1ff   : > { %3881 = vmatpush3.bf16.msra.mxu1 %v3880_v20  ;;  %3863 = vmatpush3.bf16.msra.mxu0 %v3862_v22  ;;  %v1547_v20 = vld [vmem:[#allocation13 + $0x2b0] sm:$0xff]  ;;  %v1548_v22 = vld [vmem:[#allocation13 + $0x2b8] sm:$0xff] }
 0x200   : > { %3882 = vmatprep.subr.bf16.mxu1 %v4678_v3  ;;  %3864 = vmatprep.subr.bf16.mxu0 %v4678_v3  ;;  %v3937_v25 = vpack.c.bf16 %v1548_v22, %v1547_v20  ;;  %v1699_v20 = vld [vmem:[#allocation14 + $0xe0] sm:$0xff] }
 0x201   : > { %3417 = vmatprep.mubr.msk.f32.mxu1 %vm4679_vm2, %v4677_v0  ;;  %v1664_v22 = vld [vmem:[#allocation14 + $0x60] sm:$0xff] }
 0x203   : > { %3884 = vmatpush3.bf16.msra.mxu1 %v3883_v27  ;;  %3866 = vmatpush3.bf16.msra.mxu0 %v3865_v29  ;;  %v3919_v27 = vpack.c.bf16 %v1464_v24, %v1463_v23  ;;  %v1465_v29 = vld [vmem:[#allocation13 + $0x160] sm:$0xff]  ;;  %v1665_v23 = vld [vmem:[#allocation14 + $0x68] sm:$0xff] }
 0x204   : > { %3885 = vmatprep.subr.bf16.mxu1 %v4678_v3  ;;  %3867 = vmatprep.subr.bf16.mxu0 %v4678_v3 }
 0x207   : > { %3887 = vmatpush3.bf16.msra.mxu1 %v3886_v33  ;;  %3869 = vmatpush3.bf16.msra.mxu0 %v3868_v35  ;;  %v3922_v33 = vpack.c.bf16 %v1466_v30, %v1465_v29  ;;  %v1467_v35 = vld [vmem:[#allocation13 + $0x170] sm:$0xff]  ;;  %v1667_v29 = vld [vmem:[#allocation14 + $0x78] sm:$0xff] }
 0x208   : > { %3888 = vmatprep.subr.bf16.mxu1 %v4678_v3  ;;  %3870 = vmatprep.subr.bf16.mxu0 %v4678_v3  ;;  %v3925_v38 = vpack.c.bf16 %v1468_v36, %v1467_v35 }
 0x20b   : > { %3890 = vmatpush3.bf16.msra.mxu1 %v3889_v39  ;;  %3872 = vmatpush3.bf16.msra.mxu0 %v3871_v41  ;;  %v1553_v39 = vld [vmem:[#allocation13 + $0x2e0] sm:$0xff] }
 0x20c   : > { %3891 = vmatprep.subr.bf16.mxu1 %v4678_v3  ;;  %3873 = vmatprep.subr.bf16.mxu0 %v4678_v3  ;;  %v3946_v41 = vpack.c.bf16 %v1554_v40, %v1553_v39 }
 0x20f   : > { %3893 = vmatpush3.bf16.msra.mxu1 %v3892_v45  ;;  %3875 = vmatpush3.bf16.msra.mxu0 %v3874_v47  ;;  %v3949_v45 = vpack.c.bf16 %v1556_v43, %v1555_v42  ;;  %v1688_v47 = vld [vmem:[#allocation14 + $0x88] sm:$0xff] }
 0x210   : > { %3894 = vmatprep.subr.bf16.mxu1 %v4678_v3  ;;  %3876 = vmatprep.subr.bf16.mxu0 %v4678_v3  ;;  %v3952_v49 = vpack.c.bf16 %v1688_v47, %v1687_v46  ;;  %v2878_v47 = vld [vmem:[%s5294_s4 + $0x1] ss:$0 sm:$0xff] }
 0x213   : > { %3896 = vmatpush3.bf16.msra.mxu1 %v3895_v51  ;;  %3878 = vmatpush3.bf16.msra.mxu0 %v3877_v53  ;;  %v1689_v51 = vld [vmem:[#allocation14 + $0x90] sm:$0xff]  ;;  %v3976_v53 = vpack.c.bf16 %v1653_v50, %v1652_v48 }
 0x214   : > { %3897 = vmatprep.subr.bf16.mxu1 %v4678_v3  ;;  %3903 = vmatprep.subr.bf16.mxu0 %v4678_v3  ;;  %v3955_v56 = vpack.c.bf16 %v1690_v52, %v1689_v51 }
 0x216   : > { %3383 = vmatmul.mubr.f32.vlgmr.msra.gmra.mrb[4].mxu0 %v5094_v12  ;;  %v1460_v12 = vld [vmem:[#allocation13 + $0x138] sm:$0xff] }
 0x217   : > { %3899 = vmatpush3.bf16.msra.mxu1 %v3898_v57  ;;  %3905 = vmatpush3.bf16.msra.mxu0 %v3904_v59  ;;  %v3913_v15 = vpack.c.bf16 %v1460_v12, %v1459_v11  ;;  %v3979_v57 = vpack.c.bf16 %v1655_v55, %v1654_v54  ;;  %v1692_v59 = vld [vmem:[#allocation14 + $0xa8] sm:$0xff] }
 0x218   : > { %3900 = vmatprep.subr.bf16.mxu1 %v4678_v3  ;;  %3906 = vmatprep.subr.bf16.mxu0 %v4678_v3  ;;  %v3958_v61 = vpack.c.bf16 %v1692_v59, %v1691_v58  ;;  %v1661_v12 = vld [vmem:[#allocation14 + $0x48] sm:$0xff]  ;;  %v1844_v58 = vld [vmem:[#allocation14 + $0x200] sm:$0xff] }
 0x219   : > { %3452 = vmatprep.mubr.msk.f32.mxu0 %vm4679_vm2, %v4677_v0  ;;  %v1845_v59 = vld [vmem:[#allocation14 + $0x208] sm:$0xff] }
 0x21b   : > { %3902 = vmatpush3.bf16.msra.mxu1 %v3901_v63  ;;  %3908 = vmatpush3.bf16.msra.mxu0 %v3907_v2  ;;  %v3982_v63 = vpack.c.bf16 %v1657_v62, %v1656_v60  ;;  %v1694_v2 = vld [vmem:[#allocation14 + $0xb8] sm:$0xff]  ;;  %v1669_v60 = vld [vmem:[#allocation14 + $0x180] sm:$0xff]  ;;  %v4000_v62 = vpack.c.bf16 %v1845_v59, %v1844_v58  ;;  %v2007_v59 = vld [vmem:[#allocation14 + $0x128] sm:$0xff] }
 0x21c   : > { %3927 = vmatprep.subr.bf16.mxu1 %v4678_v3  ;;  %3909 = vmatprep.subr.bf16.mxu0 %v4678_v3  ;;  %v3961_v5 = vpack.c.bf16 %v1694_v2, %v1693_v1  ;;  %v1846_v1 = vld [vmem:[#allocation14 + $0x210] sm:$0xff]  ;;  %v1847_v2 = vld [vmem:[#allocation14 + $0x218] sm:$0xff]  ;;  %v2006_v58 = vld [vmem:[#allocation14 + $0x120] sm:$0xff] }
 0x21e   : > { %3418 = vmatmul.mubr.f32.vlgmr.msra.gmra.mrb[6].mxu1 %v5102_v26  ;;  %v1549_v26 = vld [vmem:[#allocation13 + $0x2c0] sm:$0xff] }
 0x21f   : > { %3929 = vmatpush3.bf16.msra.mxu1 %v3928_v7  ;;  %3911 = vmatpush3.bf16.msra.mxu0 %v3910_v9  ;;  %v3940_v31 = vpack.c.bf16 %v1550_v28, %v1549_v26  ;;  %v3985_v7 = vpack.c.bf16 %v1659_v6, %v1658_v4  ;;  %v1696_v9 = vld [vmem:[#allocation14 + $0xc8] sm:$0xff]  ;;  %v1701_v26 = vld [vmem:[#allocation14 + $0xf0] sm:$0xff] }
 0x220   : > { %3930 = vmatprep.subr.bf16.mxu1 %v4678_v3  ;;  %3912 = vmatprep.subr.bf16.mxu0 %v4678_v3  ;;  %v3964_v11 = vpack.c.bf16 %v1696_v9, %v1695_v8  ;;  %v1666_v28 = vld [vmem:[#allocation14 + $0x70] sm:$0xff]  ;;  %v4003_v8 = vpack.c.bf16 %v1847_v2, %v1846_v1  ;;  %v2009_v2 = vld [vmem:[#allocation14 + $0x138] sm:$0xff] }
 0x221   : > { %3487 = vmatprep.mubr.msk.f32.mxu1 %vm4679_vm2, %v4677_v0  ;;  %v1671_v4 = vld [vmem:[#allocation14 + $0x190] sm:$0xff] }
 0x222   : > { %v2008_v1 = vld [vmem:[#allocation14 + $0x130] sm:$0xff] }
 0x223   : > { %3932 = vmatpush3.bf16.msra.mxu1 %v3931_v13  ;;  %3914 = vmatpush3.bf16.msra.mxu0 %v3913_v15  ;;  %v1697_v13 = vld [vmem:[#allocation14 + $0xd0] sm:$0xff]  ;;  %v3988_v15 = vpack.c.bf16 %v1661_v12, %v1660_v10  ;;  %v1848_v10 = vld [vmem:[#allocation14 + $0x220] sm:$0xff] }
 0x224   : > { %3933 = vmatprep.subr.bf16.mxu1 %v4678_v3  ;;  %3915 = vmatprep.subr.bf16.mxu0 %v4678_v3  ;;  %v3967_v18 = vpack.c.bf16 %v1698_v14, %v1697_v13  ;;  %v1673_v12 = vld [vmem:[#allocation14 + $0x1a0] sm:$0xff]  ;;  %v1674_v13 = vld [vmem:[#allocation14 + $0x1a8] sm:$0xff] }
 0x227   : > { %3935 = vmatpush3.bf16.msra.mxu1 %v3934_v19  ;;  %3917 = vmatpush3.bf16.msra.mxu0 %v3916_v21  ;;  %v3991_v19 = vpack.c.bf16 %v1663_v17, %v1662_v16  ;;  %v1700_v21 = vld [vmem:[#allocation14 + $0xe8] sm:$0xff]  ;;  %v1850_v16 = vld [vmem:[#allocation14 + $0x230] sm:$0xff]  ;;  %v1851_v17 = vld [vmem:[#allocation14 + $0x238] sm:$0xff] }
 0x228   : > { %3936 = vmatprep.subr.bf16.mxu1 %v4678_v3  ;;  %3918 = vmatprep.subr.bf16.mxu0 %v4678_v3  ;;  %v3970_v24 = vpack.c.bf16 %v1700_v21, %v1699_v20  ;;  %v4009_v20 = vpack.c.bf16 %v1851_v17, %v1850_v16  ;;  %v2100_v16 = vld [vmem:[#allocation14 + $0x2d0] sm:$0xff]  ;;  %v2101_v17 = vld [vmem:[#allocation14 + $0x2d8] sm:$0xff] }
 0x22b   : > { %3938 = vmatpush3.bf16.msra.mxu1 %v3937_v25  ;;  %3920 = vmatpush3.bf16.msra.mxu0 %v3919_v27  ;;  %v3994_v25 = vpack.c.bf16 %v1665_v23, %v1664_v22  ;;  %v1702_v27 = vld [vmem:[#allocation14 + $0xf8] sm:$0xff]  ;;  %v1852_v22 = vld [vmem:[#allocation14 + $0x240] sm:$0xff]  ;;  %v1853_v23 = vld [vmem:[#allocation14 + $0x248] sm:$0xff] }
 0x22c   : > { %3939 = vmatprep.subr.bf16.mxu1 %v4678_v3  ;;  %3921 = vmatprep.subr.bf16.mxu0 %v4678_v3  ;;  %v3973_v30 = vpack.c.bf16 %v1702_v27, %v1701_v26  ;;  %v4012_v26 = vpack.c.bf16 %v1853_v23, %v1852_v22  ;;  %v2102_v22 = vld [vmem:[#allocation14 + $0x2e0] sm:$0xff]  ;;  %v2103_v23 = vld [vmem:[#allocation14 + $0x2e8] sm:$0xff] }
 0x22f   : > { %3941 = vmatpush3.bf16.msra.mxu1 %v3940_v31  ;;  %3923 = vmatpush3.bf16.msra.mxu0 %v3922_v33  ;;  %v3997_v31 = vpack.c.bf16 %v1667_v29, %v1666_v28  ;;  %v1854_v28 = vld [vmem:[#allocation14 + $0x250] sm:$0xff]  ;;  %v1855_v29 = vld [vmem:[#allocation14 + $0x258] sm:$0xff] }
 0x230   : > { %3942 = vmatprep.subr.bf16.mxu1 %v4678_v3  ;;  %3924 = vmatprep.subr.bf16.mxu0 %v4678_v3 }
 0x233   : > { %3944 = vmatpush3.bf16.msra.mxu1 %v3943_v37  ;;  %3926 = vmatpush3.bf16.msra.mxu0 %v3925_v38 }
 0x234   : > { %3945 = vmatprep.subr.bf16.mxu1 %v4678_v3  ;;  %3951 = vmatprep.subr.bf16.mxu0 %v4678_v3 }
 0x236   : > { %3453 = vmatmul.mubr.f32.vlgmr.msra.gmra.mrb[6].mxu0 %v1451_v44 }
 0x237   : > { %3947 = vmatpush3.bf16.msra.mxu1 %v3946_v41  ;;  %3522 = vmatprep.mubr.msk.f32.mxu0 %vm4679_vm2, %v4677_v0 }
 0x238   : > { %3948 = vmatprep.subr.bf16.mxu1 %v4678_v3  ;;  %3953 = vmatpush3.bf16.msra.mxu0 %v3952_v49 }
 0x239   : > { %3954 = vmatprep.subr.bf16.mxu0 %v4678_v3 }
 0x23b   : > { %3950 = vmatpush3.bf16.msra.mxu1 %v3949_v45  ;;  %v2877_v45 = vld [vmem:[%s5294_s4] ss:$0 sm:$0xff] }
 0x23c   : > { %3975 = vmatprep.subr.bf16.mxu1 %v4678_v3  ;;  %3956 = vmatpush3.bf16.msra.mxu0 %v3955_v56 }
 0x23d   : > { %3957 = vmatprep.subr.bf16.mxu0 %v4678_v3 }
 0x23e   : > { %3488 = vmatmul.mubr.f32.vlgmr.msra.gmra.mrb[8].mxu1 %v1451_v44 }
 0x23f   : > { %3557 = vmatprep.mubr.msk.f32.mxu1 %vm4679_vm2, %v4677_v0  ;;  %3977 = vmatpush3.bf16.msra.mxu1 %v3976_v53 }
 0x240   : > { %3978 = vmatprep.subr.bf16.mxu1 %v4678_v3  ;;  %3959 = vmatpush3.bf16.msra.mxu0 %v3958_v61  ;;  %v1670_v61 = vld [vmem:[#allocation14 + $0x188] sm:$0xff] }
 0x241   : > { %3960 = vmatprep.subr.bf16.mxu0 %v4678_v3 }
 0x243   : > { %3980 = vmatpush3.bf16.msra.mxu1 %v3979_v57 }
 0x244   : > { %3981 = vmatprep.subr.bf16.mxu1 %v4678_v3  ;;  %3962 = vmatpush3.bf16.msra.mxu0 %v3961_v5  ;;  %v1672_v5 = vld [vmem:[#allocation14 + $0x198] sm:$0xff] }
 0x245   : > { %3963 = vmatprep.subr.bf16.mxu0 %v4678_v3  ;;  %v4027_v9 = vpack.c.bf16 %v1672_v5, %v1671_v4  ;;  %v2096_v4 = vld [vmem:[#allocation14 + $0x2b0] sm:$0xff]  ;;  %v2097_v5 = vld [vmem:[#allocation14 + $0x2b8] sm:$0xff] }
 0x247   : > { %3983 = vmatpush3.bf16.msra.mxu1 %v3982_v63  ;;  %v4024_v63 = vpack.c.bf16 %v1670_v61, %v1669_v60  ;;  %v2094_v60 = vld [vmem:[#allocation14 + $0x2a0] sm:$0xff]  ;;  %v2095_v61 = vld [vmem:[#allocation14 + $0x2a8] sm:$0xff] }
 0x248   : > { %3984 = vmatprep.subr.bf16.mxu1 %v4678_v3  ;;  %3965 = vmatpush3.bf16.msra.mxu0 %v3964_v11  ;;  %v1849_v11 = vld [vmem:[#allocation14 + $0x228] sm:$0xff] }
 0x249   : > { %3966 = vmatprep.subr.bf16.mxu0 %v4678_v3  ;;  %v4006_v14 = vpack.c.bf16 %v1849_v11, %v1848_v10  ;;  %v2098_v10 = vld [vmem:[#allocation14 + $0x2c0] sm:$0xff]  ;;  %v2099_v11 = vld [vmem:[#allocation14 + $0x2c8] sm:$0xff] }
 0x24b   : > { %3986 = vmatpush3.bf16.msra.mxu1 %v3985_v7 }
 0x24c   : > { %3987 = vmatprep.subr.bf16.mxu1 %v4678_v3  ;;  %3968 = vmatpush3.bf16.msra.mxu0 %v3967_v18  ;;  %v1675_v18 = vld [vmem:[#allocation14 + $0x1b0] sm:$0xff] }
 0x24d   : > { %3969 = vmatprep.subr.bf16.mxu0 %v4678_v3 }
 0x24f   : > { %3989 = vmatpush3.bf16.msra.mxu1 %v3988_v15  ;;  %v4030_v15 = vpack.c.bf16 %v1674_v13, %v1673_v12  ;;  %v4084_v13 = vpack.c.bf16 %v2099_v11, %v2098_v10  ;;  %v2304_v10 = vld [vmem:[#allocation17 + $0x68] sm:$0xff]  ;;  %v2306_v11 = vld [vmem:[#allocation17 + $0x78] sm:$0xff] }
 0x250   : > { %3990 = vmatprep.subr.bf16.mxu1 %v4678_v3  ;;  %3971 = vmatpush3.bf16.msra.mxu0 %v3970_v24  ;;  %v1677_v24 = vld [vmem:[#allocation14 + $0x1c0] sm:$0xff] }
 0x251   : > { %3972 = vmatprep.subr.bf16.mxu0 %v4678_v3 }
 0x253   : > { %3992 = vmatpush3.bf16.msra.mxu1 %v3991_v19  ;;  %v1676_v19 = vld [vmem:[#allocation14 + $0x1b8] sm:$0xff] }
 0x254   : > { %3993 = vmatprep.subr.bf16.mxu1 %v4678_v3  ;;  %3974 = vmatpush3.bf16.msra.mxu0 %v3973_v30  ;;  %v4033_v21 = vpack.c.bf16 %v1676_v19, %v1675_v18  ;;  %v1679_v30 = vld [vmem:[#allocation14 + $0x1d0] sm:$0xff]  ;;  %v4087_v19 = vpack.c.bf16 %v2101_v17, %v2100_v16  ;;  %v2308_v16 = vld [vmem:[#allocation17 + $0x88] sm:$0xff]  ;;  %v2310_v17 = vld [vmem:[#allocation17 + $0x98] sm:$0xff] }
 0x255   : > { %3999 = vmatprep.subr.bf16.mxu0 %v4678_v3 }
 0x257   : > { %3995 = vmatpush3.bf16.msra.mxu1 %v3994_v25  ;;  %v1678_v25 = vld [vmem:[#allocation14 + $0x1c8] sm:$0xff] }
 0x258   : > { %3996 = vmatprep.subr.bf16.mxu1 %v4678_v3  ;;  %v4036_v27 = vpack.c.bf16 %v1678_v25, %v1677_v24  ;;  %v4090_v25 = vpack.c.bf16 %v2103_v23, %v2102_v22  ;;  %v2312_v22 = vld [vmem:[#allocation17 + $0xa8] sm:$0xff]  ;;  %v2314_v23 = vld [vmem:[#allocation17 + $0xb8] sm:$0xff] }
 0x25b   : > { %3998 = vmatpush3.bf16.msra.mxu1 %v3997_v31  ;;  %v1680_v31 = vld [vmem:[#allocation14 + $0x1d8] sm:$0xff] }
 0x25c   : > { %4023 = vmatprep.subr.bf16.mxu1 %v4678_v3 }
 0x2c9   : > { %v1220_v32 = vpop.f32.mrb[2].mxu0 }
 0x2ca   : > { %v3314_v33 = vpop.f32.mrb[3].mxu0 }
 0x2cb   : > { %v4039_v33 = vpack.c.bf16 %v1680_v31, %v1679_v30 }
 0x2d1   : > { %v1290_v34 = vpop.f32.mrb[4].mxu1 }
 0x2d2   : > { %v1291_v35 = vadd.f32 %v1290_v34, %v1220_v32  ;;  %v3349_v36 = vpop.f32.mrb[5].mxu1  ;;  %v4015_v32 = vpack.c.bf16 %v1855_v29, %v1854_v28  ;;  %v1856_v34 = vld [vmem:[#allocation14 + $0x260] sm:$0xff]  ;;  %v2104_v28 = vld [vmem:[#allocation14 + $0x2f0] sm:$0xff]  ;;  %v2105_v29 = vld [vmem:[#allocation14 + $0x2f8] sm:$0xff] }
 0x2d3   : > { %v1681_v36 = vld [vmem:[#allocation14 + $0x1e0] sm:$0xff]  ;;  %v4093_v31 = vpack.c.bf16 %v2105_v29, %v2104_v28  ;;  %v2316_v28 = vld [vmem:[#allocation17 + $0xc8] sm:$0xff]  ;;  %v2318_v29 = vld [vmem:[#allocation17 + $0xd8] sm:$0xff] }
 0x2e9   : > { %v1377_v37 = vpop.f32.mrb[4].mxu0 }
 0x2ea   : > { %v3384_v38 = vpop.f32.mrb[5].mxu0 }
 0x2f1   : > { %v1447_v39 = vpop.f32.mrb[6].mxu1 }
 0x2f2   : > { %v1448_v40 = vadd.f32 %v1447_v39, %v1377_v37  ;;  %v3419_v41 = vpop.f32.mrb[7].mxu1  ;;  %v1682_v37 = vld [vmem:[#allocation14 + $0x1e8] sm:$0xff] }
 0x2f3   : > { %v4042_v39 = vpack.c.bf16 %v1682_v37, %v1681_v36  ;;  %v1859_v41 = vld [vmem:[#allocation14 + $0x278] sm:$0xff] }
 0x2f4   : > { %v2200_v37 = vld [vmem:[#allocation16 + $0x18] sm:$0xff] }
 0x309   : > { %v1535_v42 = vpop.f32.mrb[6].mxu0 }
 0x30a   : > { %v1539_v43 = vadd.f32 %v1535_v42, %v1291_v35  ;;  %v3454_v44 = vpop.f32.mrb[7].mxu0  ;;  %v1857_v35 = vld [vmem:[#allocation14 + $0x268] sm:$0xff]  ;;  %v1683_v42 = vld [vmem:[#allocation14 + $0x1f0] sm:$0xff] }
 0x30b   : > { %v4018_v38 = vpack.c.bf16 %v1857_v35, %v1856_v34  ;;  %v2198_v34 = vld [vmem:[#allocation16 + $0x8] sm:$0xff]  ;;  %v2199_v35 = vld [vmem:[#allocation16 + $0x10] sm:$0xff] }
 0x30c   : > { %v1633_v48 = vadd.f32 %v2877_v45, %v1539_v43  ;;  %v1684_v43 = vld [vmem:[#allocation14 + $0x1f8] sm:$0xff] }
 0x30d   : > { %v4045_v45 = vpack.c.bf16 %v1684_v43, %v1683_v42  ;;  %v2203_v42 = vld [vmem:[#allocation16 + $0x30] sm:$0xff] }
 0x30e   : > { %v1634_v52 = vmax.f32 %v1633_v48, 0.0  ;;  %v2090_v48 = vld [vmem:[#allocation14 + $0x280] sm:$0xff] }
 0x311   : > { %v1623_v46 = vpop.f32.mrb[8].mxu1 }
 0x312   : > { %v1627_v49 = vadd.f32 %v1623_v46, %v1448_v40  ;;  %v3489_v50 = vpop.f32.mrb[9].mxu1  ;;  %v1858_v40 = vld [vmem:[#allocation14 + $0x270] sm:$0xff]  ;;  %v2002_v46 = vld [vmem:[#allocation14 + $0x100] sm:$0xff] }
 0x313   : > { %v4021_v44 = vpack.c.bf16 %v1859_v41, %v1858_v40  ;;  %v2202_v40 = vld [vmem:[#allocation16 + $0x28] sm:$0xff] }
 0x314   : > { %v1640_v51 = vadd.f32 %v2878_v47, %v1627_v49  ;;  %v2003_v47 = vld [vmem:[#allocation14 + $0x108] sm:$0xff] }
 0x315   : > { %v2091_v49 = vld [vmem:[#allocation14 + $0x288] sm:$0xff]  ;;  %v4048_v50 = vpack.c.bf16 %v2003_v47, %v2002_v46  ;;  %v2207_v47 = vld [vmem:[#allocation16 + $0x50] sm:$0xff] }
 0x316   : > { %v1641_v53 = vmax.f32 %v1640_v51, 0.0  ;;  %v4072_v51 = vpack.c.bf16 %v2091_v49, %v2090_v48  ;;  %v2208_v48 = vld [vmem:[#allocation16 + $0x58] sm:$0xff] }
 0x317   : > { %v4111_v49 = vpack.c.bf16 %v2208_v48, %v2207_v47  ;;  %v2880_v47 = vld [vmem:[%s5340_s16 + $0x1] ss:$0 sm:$0xff] }
 0x318   : > { %v1642_v54 = vmax.f32 %v1634_v52, %v1641_v53  ;;  %v2004_v52 = vld [vmem:[#allocation14 + $0x110] sm:$0xff]  ;;  %v2005_v53 = vld [vmem:[#allocation14 + $0x118] sm:$0xff] }
 0x31a   : > { %1643 = vst [vmem:[#allocation5] sm:$0xff] %v1642_v54  ;;  %v2092_v54 = vld [vmem:[#allocation14 + $0x290] sm:$0xff] }
 0x321   : > { %v1644_v55 = vld [vmem:[#allocation5] ss:$2 sm:$0xf]  ;;  %v1646_v56 = vld [vmem:[#allocation5 + $0x1] ss:$2 sm:$0xf] }
 0x322   : > { %v1647_v57 = vmax.f32 %v1644_v55, %v1646_v56  ;;  %v2093_v55 = vld [vmem:[#allocation14 + $0x298] sm:$0xff]  ;;  %v4051_v56 = vpack.c.bf16 %v2005_v53, %v2004_v52  ;;  %v2211_v52 = vld [vmem:[#allocation16 + $0x70] sm:$0xff] }
 0x324   : > { %1650 = vst [vmem:[#allocation6 + $0x1] sm:$0xf] %v1647_v57  ;;  %v4075_v57 = vpack.c.bf16 %v2093_v55, %v2092_v54  ;;  %v2212_v54 = vld [vmem:[#allocation16 + $0x78] sm:$0xff] }
 0x325   : > { %v4117_v55 = vpack.c.bf16 %v2212_v54, %v2211_v52 }
 0x32b   : > { %v5169_v6 = vld [vmem:[#allocation6 + $0x1] sm:$0xf] }
 0x32c   : > { %v5171_v7 = vld [vmem:[#allocation6] sm:$0xf]  ;;  %3523 = vmatmul.mubr.f32.vlgmr.msra.gmra.mrb[8].mxu0 %v5169_v6 }
 0x32d   : > { %3558 = vmatmul.mubr.f32.vlgmr.msra.gmra.mrb[10].mxu1 %v5171_v7  ;;  %4001 = vmatpush3.bf16.msra.mxu0 %v4000_v62  ;;  %v4054_v62 = vpack.c.bf16 %v2007_v59, %v2006_v58  ;;  %v2291_v58 = vld [vmem:[#allocation17] sm:$0xff] }
 0x32e   : > { %4025 = vmatpush3.bf16.msra.mxu1 %v4024_v63  ;;  %4002 = vmatprep.subr.bf16.mxu0 %v4678_v3  ;;  %v4078_v63 = vpack.c.bf16 %v2095_v61, %v2094_v60  ;;  %v2293_v60 = vld [vmem:[#allocation17 + $0x10] sm:$0xff]  ;;  %v2296_v61 = vld [vmem:[#allocation17 + $0x28] sm:$0xff] }
 0x32f   : > { %4026 = vmatprep.subr.bf16.mxu1 %v4678_v3  ;;  %3592 = vmatprep.mubr.msk.f32.mxu0 %vm4679_vm2, %v4677_v0 }
 0x330   : > { %3627 = vmatprep.mubr.msk.f32.mxu1 %vm4679_vm2, %v4677_v0 }
 0x331   : > { %4004 = vmatpush3.bf16.msra.mxu0 %v4003_v8  ;;  %v2010_v8 = vld [vmem:[#allocation14 + $0x140] sm:$0xff] }
 0x332   : > { %4028 = vmatpush3.bf16.msra.mxu1 %v4027_v9  ;;  %4005 = vmatprep.subr.bf16.mxu0 %v4678_v3  ;;  %v2011_v9 = vld [vmem:[#allocation14 + $0x148] sm:$0xff] }
 0x333   : > { %4029 = vmatprep.subr.bf16.mxu1 %v4678_v3  ;;  %v4060_v12 = vpack.c.bf16 %v2011_v9, %v2010_v8  ;;  %v2301_v9 = vld [vmem:[#allocation17 + $0x50] sm:$0xff] }
 0x335   : > { %4007 = vmatpush3.bf16.msra.mxu0 %v4006_v14  ;;  %v2012_v14 = vld [vmem:[#allocation14 + $0x150] sm:$0xff] }
 0x336   : > { %4031 = vmatpush3.bf16.msra.mxu1 %v4030_v15  ;;  %4008 = vmatprep.subr.bf16.mxu0 %v4678_v3  ;;  %v2013_v15 = vld [vmem:[#allocation14 + $0x158] sm:$0xff] }
 0x337   : > { %4032 = vmatprep.subr.bf16.mxu1 %v4678_v3  ;;  %v4063_v18 = vpack.c.bf16 %v2013_v15, %v2012_v14  ;;  %v2303_v14 = vld [vmem:[#allocation17 + $0x60] sm:$0xff]  ;;  %v2305_v15 = vld [vmem:[#allocation17 + $0x70] sm:$0xff] }
 0x339   : > { %4010 = vmatpush3.bf16.msra.mxu0 %v4009_v20  ;;  %v2014_v20 = vld [vmem:[#allocation14 + $0x160] sm:$0xff] }
 0x33a   : > { %4034 = vmatpush3.bf16.msra.mxu1 %v4033_v21  ;;  %4011 = vmatprep.subr.bf16.mxu0 %v4678_v3  ;;  %v2015_v21 = vld [vmem:[#allocation14 + $0x168] sm:$0xff] }
 0x33b   : > { %4035 = vmatprep.subr.bf16.mxu1 %v4678_v3  ;;  %v4066_v24 = vpack.c.bf16 %v2015_v21, %v2014_v20  ;;  %v2307_v20 = vld [vmem:[#allocation17 + $0x80] sm:$0xff]  ;;  %v2309_v21 = vld [vmem:[#allocation17 + $0x90] sm:$0xff] }
 0x33d   : > { %4013 = vmatpush3.bf16.msra.mxu0 %v4012_v26  ;;  %v2016_v26 = vld [vmem:[#allocation14 + $0x170] sm:$0xff] }
 0x33e   : > { %4037 = vmatpush3.bf16.msra.mxu1 %v4036_v27  ;;  %4014 = vmatprep.subr.bf16.mxu0 %v4678_v3  ;;  %v2017_v27 = vld [vmem:[#allocation14 + $0x178] sm:$0xff] }
 0x33f   : > { %4038 = vmatprep.subr.bf16.mxu1 %v4678_v3  ;;  %v4069_v30 = vpack.c.bf16 %v2017_v27, %v2016_v26  ;;  %v2311_v26 = vld [vmem:[#allocation17 + $0xa0] sm:$0xff]  ;;  %v2313_v27 = vld [vmem:[#allocation17 + $0xb0] sm:$0xff] }
 0x341   : > { %4016 = vmatpush3.bf16.msra.mxu0 %v4015_v32  ;;  %v2000_v32 = vld [vmem:[#allocation6 + $0x2] sm:$0xf] }
 0x342   : > { %4040 = vmatpush3.bf16.msra.mxu1 %v4039_v33  ;;  %4017 = vmatprep.subr.bf16.mxu0 %v4678_v3  ;;  %v2197_v33 = vld [vmem:[#allocation16] sm:$0xff] }
 0x343   : > { %4041 = vmatprep.subr.bf16.mxu1 %v4678_v3  ;;  %v4096_v36 = vpack.c.bf16 %v2198_v34, %v2197_v33  ;;  %v2317_v33 = vld [vmem:[#allocation17 + $0xd0] sm:$0xff] }
 0x345   : > { %4019 = vmatpush3.bf16.msra.mxu0 %v4018_v38  ;;  %v4099_v38 = vpack.c.bf16 %v2200_v37, %v2199_v35 }
 0x346   : > { %4043 = vmatpush3.bf16.msra.mxu1 %v4042_v39  ;;  %4020 = vmatprep.subr.bf16.mxu0 %v4678_v3  ;;  %v2201_v39 = vld [vmem:[#allocation16 + $0x20] sm:$0xff] }
 0x347   : > { %4044 = vmatprep.subr.bf16.mxu1 %v4678_v3  ;;  %v4102_v41 = vpack.c.bf16 %v2202_v40, %v2201_v39 }
 0x349   : > { %4022 = vmatpush3.bf16.msra.mxu0 %v4021_v44  ;;  %v2205_v44 = vld [vmem:[#allocation16 + $0x40] sm:$0xff] }
 0x34a   : > { %4046 = vmatpush3.bf16.msra.mxu1 %v4045_v45  ;;  %4047 = vmatprep.subr.bf16.mxu0 %v4678_v3  ;;  %v2206_v45 = vld [vmem:[#allocation16 + $0x48] sm:$0xff] }
 0x34b   : > { %4071 = vmatprep.subr.bf16.mxu1 %v4678_v3  ;;  %v4108_v46 = vpack.c.bf16 %v2206_v45, %v2205_v44  ;;  %v2879_v45 = vld [vmem:[%s5340_s16] ss:$0 sm:$0xff] }
 0x34c   : > { %3593 = vmatmul.mubr.f32.vlgmr.msra.gmra.mrb[10].mxu0 %v5169_v6  ;;  %v4057_v6 = vpack.c.bf16 %v2009_v2, %v2008_v1  ;;  %v2295_v2 = vld [vmem:[#allocation17 + $0x20] sm:$0xff] }
 0x34d   : > { %3628 = vmatmul.mubr.f32.vlgmr.msra.gmra.mrb[12].mxu1 %v5171_v7  ;;  %4049 = vmatpush3.bf16.msra.mxu0 %v4048_v50  ;;  %v4081_v7 = vpack.c.bf16 %v2097_v5, %v2096_v4  ;;  %v2209_v50 = vld [vmem:[#allocation16 + $0x60] sm:$0xff]  ;;  %v2297_v4 = vld [vmem:[#allocation17 + $0x30] sm:$0xff]  ;;  %v2300_v5 = vld [vmem:[#allocation17 + $0x48] sm:$0xff] }
 0x34e   : > { %4073 = vmatpush3.bf16.msra.mxu1 %v4072_v51  ;;  %4050 = vmatprep.subr.bf16.mxu0 %v4678_v3  ;;  %v2210_v51 = vld [vmem:[#allocation16 + $0x68] sm:$0xff] }
 0x34f   : > { %4074 = vmatprep.subr.bf16.mxu1 %v4678_v3  ;;  %3662 = vmatprep.mubr.msk.f32.mxu0 %vm4679_vm2, %v4677_v0  ;;  %v4114_v53 = vpack.c.bf16 %v2210_v51, %v2209_v50 }
 0x350   : > { %3697 = vmatprep.mubr.msk.f32.mxu1 %vm4679_vm2, %v4677_v0 }
 0x351   : > { %4052 = vmatpush3.bf16.msra.mxu0 %v4051_v56  ;;  %v2292_v56 = vld [vmem:[#allocation17 + $0x8] sm:$0xff] }
 0x352   : > { %4076 = vmatpush3.bf16.msra.mxu1 %v4075_v57  ;;  %4053 = vmatprep.subr.bf16.mxu0 %v4678_v3  ;;  %v2294_v57 = vld [vmem:[#allocation17 + $0x18] sm:$0xff] }
 0x353   : > { %4077 = vmatprep.subr.bf16.mxu1 %v4678_v3  ;;  %v4119_v59 = vpack.c.bf16 %v2294_v57, %v2292_v56 }
 0x355   : > { %4055 = vmatpush3.bf16.msra.mxu0 %v4054_v62  ;;  %v2298_v62 = vld [vmem:[#allocation17 + $0x38] sm:$0xff] }
 0x356   : > { %4079 = vmatpush3.bf16.msra.mxu1 %v4078_v63  ;;  %4056 = vmatprep.subr.bf16.mxu0 %v4678_v3  ;;  %v4121_v63 = vpack.c.bf16 %v2293_v60, %v2291_v58  ;;  %v4123_v1 = vpack.c.bf16 %v2298_v62, %v2296_v61  ;;  %v2320_v60 = vld [vmem:[#allocation17 + $0xe8] sm:$0xff]  ;;  %v2322_v61 = vld [vmem:[#allocation17 + $0xf8] sm:$0xff] }
 0x357   : > { %4080 = vmatprep.subr.bf16.mxu1 %v4678_v3  ;;  %v4147_v62 = vpack.c.bf16 %v2322_v61, %v2320_v60 }
 0x359   : > { %4058 = vmatpush3.bf16.msra.mxu0 %v4057_v6  ;;  %v2302_v6 = vld [vmem:[#allocation17 + $0x58] sm:$0xff] }
 0x35a   : > { %4082 = vmatpush3.bf16.msra.mxu1 %v4081_v7  ;;  %4059 = vmatprep.subr.bf16.mxu0 %v4678_v3  ;;  %v4125_v7 = vpack.c.bf16 %v2297_v4, %v2295_v2  ;;  %v4127_v8 = vpack.c.bf16 %v2302_v6, %v2300_v5  ;;  %v2409_v4 = vld [vmem:[#allocation19 + $0x8] sm:$0xff]  ;;  %v2412_v5 = vld [vmem:[#allocation19 + $0x20] sm:$0xff] }
 0x35b   : > { %4083 = vmatprep.subr.bf16.mxu1 %v4678_v3  ;;  %v2408_v6 = vld [vmem:[#allocation19] sm:$0xff] }
 0x35d   : > { %4061 = vmatpush3.bf16.msra.mxu0 %v4060_v12 }
 0x35e   : > { %4085 = vmatpush3.bf16.msra.mxu1 %v4084_v13  ;;  %4062 = vmatprep.subr.bf16.mxu0 %v4678_v3  ;;  %v4131_v13 = vpack.c.bf16 %v2306_v11, %v2304_v10 }
 0x35f   : > { %4086 = vmatprep.subr.bf16.mxu1 %v4678_v3 }
 0x361   : > { %4064 = vmatpush3.bf16.msra.mxu0 %v4063_v18  ;;  %v4133_v18 = vpack.c.bf16 %v2305_v15, %v2303_v14  ;;  %v2421_v14 = vld [vmem:[#allocation19 + $0x68] sm:$0xff]  ;;  %v2424_v15 = vld [vmem:[#allocation19 + $0x80] sm:$0xff] }
 0x362   : > { %4088 = vmatpush3.bf16.msra.mxu1 %v4087_v19  ;;  %4065 = vmatprep.subr.bf16.mxu0 %v4678_v3  ;;  %v4135_v19 = vpack.c.bf16 %v2310_v17, %v2308_v16  ;;  %v4159_v17 = vpack.c.bf16 %v2424_v15, %v2421_v14  ;;  %v2484_v14 = vld [vmem:[#allocation19 + $0x260] sm:$0xff] }
 0x363   : > { %4089 = vmatprep.subr.bf16.mxu1 %v4678_v3 }
 0x365   : > { %4067 = vmatpush3.bf16.msra.mxu0 %v4066_v24  ;;  %v4137_v24 = vpack.c.bf16 %v2309_v21, %v2307_v20  ;;  %v2427_v20 = vld [vmem:[#allocation19 + $0x98] sm:$0xff]  ;;  %v2430_v21 = vld [vmem:[#allocation19 + $0xb0] sm:$0xff] }
 0x366   : > { %4091 = vmatpush3.bf16.msra.mxu1 %v4090_v25  ;;  %4068 = vmatprep.subr.bf16.mxu0 %v4678_v3  ;;  %v4139_v25 = vpack.c.bf16 %v2314_v23, %v2312_v22  ;;  %v4163_v23 = vpack.c.bf16 %v2430_v21, %v2427_v20  ;;  %v2490_v20 = vld [vmem:[#allocation19 + $0x290] sm:$0xff] }
 0x367   : > { %4092 = vmatprep.subr.bf16.mxu1 %v4678_v3 }
 0x369   : > { %4070 = vmatpush3.bf16.msra.mxu0 %v4069_v30  ;;  %v4141_v30 = vpack.c.bf16 %v2313_v27, %v2311_v26  ;;  %v2433_v26 = vld [vmem:[#allocation19 + $0xc8] sm:$0xff]  ;;  %v2436_v27 = vld [vmem:[#allocation19 + $0xe0] sm:$0xff] }
 0x36a   : > { %4094 = vmatpush3.bf16.msra.mxu1 %v4093_v31  ;;  %4095 = vmatprep.subr.bf16.mxu0 %v4678_v3  ;;  %v4143_v31 = vpack.c.bf16 %v2318_v29, %v2316_v28  ;;  %v2458_v28 = vld [vmem:[#allocation19 + $0x190] sm:$0xff]  ;;  %v2461_v29 = vld [vmem:[#allocation19 + $0x1a8] sm:$0xff] }
 0x36b   : > { %4120 = vmatprep.subr.bf16.mxu1 %v4119_v59 }
 0x36c   : > { %3663 = vmatmul.mubr.f32.vlgmr.msra.gmra.mrb[12].mxu0 %v2000_v32 }
 0x36d   : > { %3698 = vmatmul.mubr.f32.vlgmr.msra.gmra.mrb[14].mxu1 %v2000_v32  ;;  %3732 = vmatprep.mubr.msk.f32.mxu0 %vm4679_vm2, %v4677_v0  ;;  %v2315_v32 = vld [vmem:[#allocation17 + $0xc0] sm:$0xff] }
 0x36e   : > { %2399 = vmatprep.mubr.f32.mxu1 %v4677_v0  ;;  %4097 = vmatpush3.bf16.msra.mxu0 %v4096_v36  ;;  %v2204_v0 = vld [vmem:[#allocation16 + $0x38] sm:$0xff]  ;;  %v4145_v34 = vpack.c.bf16 %v2317_v33, %v2315_v32  ;;  %v4167_v32 = vpack.c.bf16 %v2436_v27, %v2433_v26  ;;  %v2432_v33 = vld [vmem:[#allocation19 + $0xc0] sm:$0xff] }
 0x36f   : > { %4098 = vmatprep.subr.bf16.mxu0 %v4678_v3  ;;  %v4105_v43 = vpack.c.bf16 %v2204_v0, %v2203_v42  ;;  %4122 = vmatpush1.bf16.msra.mxu1 %v4121_v63  ;;  %v2319_v63 = vld [vmem:[#allocation17 + $0xe0] sm:$0xff] }
 0x370   : > { %4124 = vmatprep.subr.bf16.mxu1 %v4123_v1  ;;  %v2321_v1 = vld [vmem:[#allocation17 + $0xf0] sm:$0xff]  ;;  %v2496_v26 = vld [vmem:[#allocation19 + $0x2c0] sm:$0xff] }
 0x371   : > { %v4149_v2 = vpack.c.bf16 %v2321_v1, %v2319_v63  ;;  %v2465_v63 = vld [vmem:[#allocation19 + $0x1c8] sm:$0xff] }
 0x372   : > { %4100 = vmatpush3.bf16.msra.mxu0 %v4099_v38  ;;  %v2469_v1 = vld [vmem:[#allocation19 + $0x1e8] sm:$0xff] }
 0x373   : > { %4101 = vmatprep.subr.bf16.mxu0 %v4678_v3  ;;  %4126 = vmatpush1.bf16.msra.mxu1 %v4125_v7  ;;  %v4151_v7 = vpack.c.bf16 %v2412_v5, %v2409_v4 }
 0x374   : > { %4128 = vmatprep.subr.bf16.mxu1 %v4127_v8  ;;  %v2411_v8 = vld [vmem:[#allocation19 + $0x18] sm:$0xff] }
 0x375   : > { %v4153_v10 = vpack.c.bf16 %v2411_v8, %v2408_v6  ;;  %v2468_v6 = vld [vmem:[#allocation19 + $0x1e0] sm:$0xff]  ;;  %v2475_v8 = vld [vmem:[#allocation19 + $0x218] sm:$0xff] }
 0x376   : > { %4103 = vmatpush3.bf16.msra.mxu0 %v4102_v41 }
 0x377   : > { %4104 = vmatprep.subr.bf16.mxu0 %v4678_v3 }
 0x37a   : > { %4106 = vmatpush3.bf16.msra.mxu0 %v4105_v43 }
 0x37b   : > { %4107 = vmatprep.subr.bf16.mxu0 %v4678_v3 }
 0x37e   : > { %4109 = vmatpush3.bf16.msra.mxu0 %v4108_v46 }
 0x37f   : > { %4110 = vmatprep.subr.bf16.mxu0 %v4678_v3 }
 0x382   : > { %4112 = vmatpush3.bf16.msra.mxu0 %v4111_v49 }
 0x383   : > { %4113 = vmatprep.subr.bf16.mxu0 %v4678_v3 }
 0x386   : > { %4115 = vmatpush3.bf16.msra.mxu0 %v4114_v53 }
 0x387   : > { %4116 = vmatprep.subr.bf16.mxu0 %v4678_v3  ;;  %v2299_v3 = vld [vmem:[#allocation17 + $0x40] sm:$0xff] }
 0x388   : > { %v4129_v12 = vpack.c.bf16 %v2301_v9, %v2299_v3  ;;  %v2415_v3 = vld [vmem:[#allocation19 + $0x38] sm:$0xff]  ;;  %v2418_v9 = vld [vmem:[#allocation19 + $0x50] sm:$0xff] }
 0x389   : > { %v4155_v11 = vpack.c.bf16 %v2418_v9, %v2415_v3  ;;  %v2478_v3 = vld [vmem:[#allocation19 + $0x230] sm:$0xff] }
 0x38a   : > { %4118 = vmatpush3.bf16.msra.mxu0 %v4117_v55  ;;  %4130 = vmatpush1.bf16.msra.mxu1 %v4129_v12  ;;  %v2414_v12 = vld [vmem:[#allocation19 + $0x30] sm:$0xff] }
 0x38b   : > { %4132 = vmatprep.subr.bf16.mxu1 %v4131_v13  ;;  %v2417_v13 = vld [vmem:[#allocation19 + $0x48] sm:$0xff]  ;;  %4152 = vmatprep.subr.bf16.mxu0 %v4151_v7  ;;  %v2471_v7 = vld [vmem:[#allocation19 + $0x1f8] sm:$0xff] }
 0x38c   : > { %v4157_v16 = vpack.c.bf16 %v2417_v13, %v2414_v12  ;;  %v4193_v9 = vpack.c.bf16 %v2471_v7, %v2468_v6  ;;  %v2477_v12 = vld [vmem:[#allocation19 + $0x228] sm:$0xff]  ;;  %v2492_v7 = vld [vmem:[#allocation19 + $0x2a0] sm:$0xff] }
 0x38d   : > { %v2481_v13 = vld [vmem:[#allocation19 + $0x248] sm:$0xff] }
 0x38e   : > { %4134 = vmatpush1.bf16.msra.mxu1 %v4133_v18  ;;  %v2420_v18 = vld [vmem:[#allocation19 + $0x60] sm:$0xff] }
 0x38f   : > { %4136 = vmatprep.subr.bf16.mxu1 %v4135_v19  ;;  %v2423_v19 = vld [vmem:[#allocation19 + $0x78] sm:$0xff] }
 0x390   : > { %v4161_v22 = vpack.c.bf16 %v2423_v19, %v2420_v18  ;;  %v2483_v18 = vld [vmem:[#allocation19 + $0x258] sm:$0xff] }
 0x391   : > { %v2487_v19 = vld [vmem:[#allocation19 + $0x278] sm:$0xff] }
 0x392   : > { %4138 = vmatpush1.bf16.msra.mxu1 %v4137_v24  ;;  %v2426_v24 = vld [vmem:[#allocation19 + $0x90] sm:$0xff] }
 0x393   : > { %4140 = vmatprep.subr.bf16.mxu1 %v4139_v25  ;;  %v2429_v25 = vld [vmem:[#allocation19 + $0xa8] sm:$0xff] }
 0x396   : > { %4142 = vmatpush1.bf16.msra.mxu1 %v4141_v30  ;;  %v4165_v30 = vpack.c.bf16 %v2429_v25, %v2426_v24  ;;  %v2489_v24 = vld [vmem:[#allocation19 + $0x288] sm:$0xff] }
 0x397   : > { %4144 = vmatprep.subr.bf16.mxu1 %v4143_v31  ;;  %v4215_v31 = vpack.c.bf16 %v2461_v29, %v2458_v28  ;;  %v2493_v25 = vld [vmem:[#allocation19 + $0x2a8] sm:$0xff]  ;;  %v2881_v29 = vld [vmem:[%s5341_s22] ss:$0 sm:$0xff]  ;;  %s5344_s22 = sld [smem:[#allocation32_spill]] }
 0x398   : > { %v4207_v28 = vpack.c.bf16 %v2496_v26, %v2493_v25 }
 0x39a   : > { %4146 = vmatpush1.bf16.msra.mxu1 %v4145_v34  ;;  %v2435_v34 = vld [vmem:[#allocation19 + $0xd8] sm:$0xff] }
 0x39b   : > { %4148 = vmatprep.subr.bf16.mxu1 %v4147_v62  ;;  %v2462_v62 = vld [vmem:[#allocation19 + $0x1b0] sm:$0xff] }
 0x39c   : > { %v4189_v4 = vpack.c.bf16 %v2465_v63, %v2462_v62  ;;  %v2440_v63 = vld [vmem:[#allocation19 + $0x100] sm:$0xff] }
 0x39d   : > { %s5246_s13 = scalar_lea.hbm %s5344_s22, %s4256_s29 }
 0x39e   : > { %4150 = vmatpush1.bf16.msra.mxu1 %v4149_v2  ;;  %v2472_v2 = vld [vmem:[#allocation19 + $0x200] sm:$0xff] }
 0x39f   : > { %4216 = vmatprep.subr.bf16.mxu1 %v4215_v31  ;;  %v4191_v5 = vpack.c.bf16 %v2472_v2, %v2469_v1  ;;  %v2413_v31 = vld [vmem:[#allocation19 + $0x28] sm:$0xff]  ;;  %v2443_v1 = vld [vmem:[#allocation19 + $0x118] sm:$0xff]  ;;  %v2494_v2 = vld [vmem:[#allocation19 + $0x2b0] sm:$0xff] }
 0x3ff   : > { %v1769_v35 = vpop.f32.mrb[8].mxu0 }
 0x400   : > { %v1839_v36 = vpop.f32.mrb[10].mxu1  ;;  %v3524_v38 = vpop.f32.mrb[9].mxu0 }
 0x401   : > { %v1840_v37 = vadd.f32 %v1839_v36, %v1769_v35  ;;  %v3559_v39 = vpop.f32.mrb[11].mxu1  ;;  %v2439_v35 = vld [vmem:[#allocation19 + $0xf8] sm:$0xff]  ;;  %v2442_v36 = vld [vmem:[#allocation19 + $0x110] sm:$0xff] }
 0x402   : > { %v4171_v38 = vpack.c.bf16 %v2442_v36, %v2439_v35  ;;  %v2438_v39 = vld [vmem:[#allocation19 + $0xf0] sm:$0xff] }
 0x41f   : > { %v1926_v40 = vpop.f32.mrb[10].mxu0 }
 0x420   : > { %v1996_v41 = vpop.f32.mrb[12].mxu1  ;;  %v3594_v0 = vpop.f32.mrb[11].mxu0 }
 0x421   : > { %v1997_v42 = vadd.f32 %v1996_v41, %v1926_v40  ;;  %v3629_v43 = vpop.f32.mrb[13].mxu1  ;;  %v2441_v40 = vld [vmem:[#allocation19 + $0x108] sm:$0xff] }
 0x422   : > { %v2445_v41 = vld [vmem:[#allocation19 + $0x128] sm:$0xff]  ;;  %v4173_v0 = vpack.c.bf16 %v2441_v40, %v2438_v39  ;;  %v2416_v40 = vld [vmem:[#allocation19 + $0x40] sm:$0xff] }
 0x43f   : > { %v2084_v44 = vpop.f32.mrb[12].mxu0 }
 0x440   : > { %v2172_v46 = vpop.f32.mrb[14].mxu1  ;;  %v2088_v48 = vadd.f32 %v2084_v44, %v1840_v37  ;;  %v3664_v50 = vpop.f32.mrb[13].mxu0  ;;  %v4169_v37 = vpack.c.bf16 %v2435_v34, %v2432_v33  ;;  %v2444_v44 = vld [vmem:[#allocation19 + $0x120] sm:$0xff]  ;;  %v2467_v34 = vld [vmem:[#allocation19 + $0x1d8] sm:$0xff] }
 0x441   : > { %v2176_v49 = vadd.f32 %v2172_v46, %v1997_v42  ;;  %v3699_v51 = vpop.f32.mrb[15].mxu1  ;;  %v2448_v42 = vld [vmem:[#allocation19 + $0x140] sm:$0xff]  ;;  %v2451_v46 = vld [vmem:[#allocation19 + $0x158] sm:$0xff]  ;;  %v2450_v50 = vld [vmem:[#allocation19 + $0x150] sm:$0xff] }
 0x442   : > { %v2182_v52 = vadd.f32 %v2879_v45, %v2088_v48  ;;  %v4175_v43 = vpack.c.bf16 %v2448_v42, %v2445_v41  ;;  %v2447_v45 = vld [vmem:[#allocation19 + $0x138] sm:$0xff]  ;;  %v2453_v51 = vld [vmem:[#allocation19 + $0x168] sm:$0xff]  ;;  %v2464_v33 = vld [vmem:[#allocation19 + $0x1c0] sm:$0xff] }
 0x443   : > { %v2189_v53 = vadd.f32 %v2880_v47, %v2176_v49  ;;  %v2454_v47 = vld [vmem:[#allocation19 + $0x170] sm:$0xff]  ;;  %v4177_v48 = vpack.c.bf16 %v2447_v45, %v2444_v44  ;;  %v4219_v39 = vpack.c.bf16 %v2467_v34, %v2464_v33  ;;  %v2419_v41 = vld [vmem:[#allocation19 + $0x58] sm:$0xff] }
 0x444   : > { %v2183_v54 = vmax.f32 %v2182_v52, 0.0  ;;  %v4179_v49 = vpack.c.bf16 %v2454_v47, %v2451_v46  ;;  %v2457_v52 = vld [vmem:[#allocation19 + $0x188] sm:$0xff]  ;;  %v2470_v42 = vld [vmem:[#allocation19 + $0x1f0] sm:$0xff]  ;;  %v2476_v47 = vld [vmem:[#allocation19 + $0x220] sm:$0xff] }
 0x445   : > { %v2190_v55 = vmax.f32 %v2189_v53, 0.0  ;;  %v2460_v53 = vld [vmem:[#allocation19 + $0x1a0] sm:$0xff]  ;;  %v2422_v45 = vld [vmem:[#allocation19 + $0x70] sm:$0xff]  ;;  %v2425_v46 = vld [vmem:[#allocation19 + $0x88] sm:$0xff] }
 0x447   : > { %v2191_v56 = vmax.f32 %v2183_v54, %v2190_v55  ;;  %v4181_v54 = vpack.c.bf16 %v2453_v51, %v2450_v50  ;;  %v4183_v55 = vpack.c.bf16 %v2460_v53, %v2457_v52  ;;  %v2428_v51 = vld [vmem:[#allocation19 + $0xa0] sm:$0xff]  ;;  %v2431_v52 = vld [vmem:[#allocation19 + $0xb8] sm:$0xff]  ;;  %v2482_v53 = vld [vmem:[#allocation19 + $0x250] sm:$0xff] }
 0x449   : > { %2192 = vst [vmem:[#allocation7] sm:$0xf] %v2191_v56  ;;  %v2456_v56 = vld [vmem:[#allocation19 + $0x180] sm:$0xff] }
 0x450   : > { %v2193_v57 = vld [vmem:[#allocation7] ss:$2 sm:$0x3]  ;;  %v2195_v58 = vld [vmem:[#allocation7 + $0x1] ss:$2 sm:$0x3] }
 0x451   : > { %v2196_v59 = vmax.f32 %v2193_v57, %v2195_v58  ;;  %v2459_v57 = vld [vmem:[#allocation19 + $0x198] sm:$0xff] }
 0x452   : > { %v2463_v58 = vld [vmem:[#allocation19 + $0x1b8] sm:$0xff]  ;;  %v4185_v60 = vpack.c.bf16 %v2459_v57, %v2456_v56  ;;  %v2434_v57 = vld [vmem:[#allocation19 + $0xd0] sm:$0xff] }
 0x453   : > { %3733 = vmatmul.mubr.f32.vlgmr.msra.gmra.mrb[14].mxu0 %v2196_v59  ;;  %v2466_v59 = vld [vmem:[#allocation19 + $0x1d0] sm:$0xff] }
 0x454   : > { %4154 = vmatpush1.bf16.msra.mxu0 %v4153_v10  ;;  %v4187_v61 = vpack.c.bf16 %v2466_v59, %v2463_v58  ;;  %v4195_v10 = vpack.c.bf16 %v2478_v3, %v2475_v8  ;;  %v2437_v58 = vld [vmem:[#allocation19 + $0xe8] sm:$0xff]  ;;  %v2488_v59 = vld [vmem:[#allocation19 + $0x280] sm:$0xff]  ;;  %v2495_v8 = vld [vmem:[#allocation19 + $0x2b8] sm:$0xff] }
 0x455   : > { %4156 = vmatprep.subr.bf16.mxu0 %v4155_v11  ;;  %v2474_v11 = vld [vmem:[#allocation19 + $0x210] sm:$0xff] }
 0x456   : > { %v4197_v15 = vpack.c.bf16 %v2477_v12, %v2474_v11  ;;  %v2446_v3 = vld [vmem:[#allocation19 + $0x130] sm:$0xff]  ;;  %v2499_v12 = vld [vmem:[#allocation19 + $0x2d8] sm:$0xff] }
 0x458   : > { %4158 = vmatpush1.bf16.msra.mxu0 %v4157_v16  ;;  %v4199_v16 = vpack.c.bf16 %v2484_v14, %v2481_v13  ;;  %v2502_v13 = vld [vmem:[#allocation19 + $0x2f0] sm:$0xff]  ;;  %v2500_v14 = vld [vmem:[#allocation19 + $0x2e0] sm:$0xff] }
 0x459   : > { %4160 = vmatprep.subr.bf16.mxu0 %v4159_v17  ;;  %v2480_v17 = vld [vmem:[#allocation19 + $0x240] sm:$0xff] }
 0x45a   : > { %v4201_v21 = vpack.c.bf16 %v2483_v18, %v2480_v17  ;;  %v2498_v17 = vld [vmem:[#allocation19 + $0x2d0] sm:$0xff]  ;;  %v2501_v18 = vld [vmem:[#allocation19 + $0x2e8] sm:$0xff] }
 0x45c   : > { %4162 = vmatpush1.bf16.msra.mxu0 %v4161_v22  ;;  %v4203_v22 = vpack.c.bf16 %v2490_v20, %v2487_v19  ;;  %v4213_v20 = vpack.c.bf16 %v2501_v18, %v2498_v17 }
 0x45d   : > { %4164 = vmatprep.subr.bf16.mxu0 %v4163_v23  ;;  %v2486_v23 = vld [vmem:[#allocation19 + $0x270] sm:$0xff] }
 0x45e   : > { %v4205_v27 = vpack.c.bf16 %v2489_v24, %v2486_v23  ;;  %v2325_v24 = vlaneseq }
 0x460   : > { %4166 = vmatpush1.bf16.msra.mxu0 %v4165_v30  ;;  %v2410_v30 = vld [vmem:[#allocation19 + $0x10] sm:$0xff]  ;;  %v2326_v25 = vshrl.u32 %v2325_v24, 7 }
 0x461   : > { %4168 = vmatprep.subr.bf16.mxu0 %v4167_v32 }
 0x462   : > { %v2327_v26 = vsub.s32 0, %v2326_v25 }
 0x464   : > { %4170 = vmatpush1.bf16.msra.mxu0 %v4169_v37  ;;  %v4217_v37 = vpack.c.bf16 %v2413_v31, %v2410_v30 }
 0x465   : > { %4172 = vmatprep.subr.bf16.mxu0 %v4171_v38 }
 0x468   : > { %4174 = vmatpush1.bf16.msra.mxu0 %v4173_v0  ;;  %v2473_v0 = vld [vmem:[#allocation19 + $0x208] sm:$0xff] }
 0x469   : > { %4176 = vmatprep.subr.bf16.mxu0 %v4175_v43  ;;  %v4221_v43 = vpack.c.bf16 %v2419_v41, %v2416_v40  ;;  %v4223_v44 = vpack.c.bf16 %v2473_v0, %v2470_v42 }
 0x46c   : > { %4178 = vmatpush1.bf16.msra.mxu0 %v4177_v48  ;;  %v2479_v48 = vld [vmem:[#allocation19 + $0x238] sm:$0xff] }
 0x46d   : > { %4180 = vmatprep.subr.bf16.mxu0 %v4179_v49  ;;  %v4225_v49 = vpack.c.bf16 %v2425_v46, %v2422_v45  ;;  %v4227_v50 = vpack.c.bf16 %v2479_v48, %v2476_v47 }
 0x470   : > { %4182 = vmatpush1.bf16.msra.mxu0 %v4181_v54  ;;  %v2485_v54 = vld [vmem:[#allocation19 + $0x268] sm:$0xff] }
 0x471   : > { %4184 = vmatprep.subr.bf16.mxu0 %v4183_v55  ;;  %v4229_v55 = vpack.c.bf16 %v2431_v52, %v2428_v51  ;;  %v4231_v56 = vpack.c.bf16 %v2485_v54, %v2482_v53 }
 0x474   : > { %4186 = vmatpush1.bf16.msra.mxu0 %v4185_v60  ;;  %v2491_v60 = vld [vmem:[#allocation19 + $0x298] sm:$0xff] }
 0x475   : > { %4188 = vmatprep.subr.bf16.mxu0 %v4187_v61  ;;  %v4233_v61 = vpack.c.bf16 %v2437_v58, %v2434_v57  ;;  %v4235_v62 = vpack.c.bf16 %v2491_v60, %v2488_v59 }
 0x478   : > { %4190 = vmatpush1.bf16.msra.mxu0 %v4189_v4  ;;  %v2497_v4 = vld [vmem:[#allocation19 + $0x2c8] sm:$0xff] }
 0x479   : > { %4192 = vmatprep.subr.bf16.mxu0 %v4191_v5  ;;  %v4237_v5 = vpack.c.bf16 %v2443_v1, %v2440_v63  ;;  %v4239_v6 = vpack.c.bf16 %v2497_v4, %v2494_v2 }
 0x47c   : > { %4194 = vmatpush1.bf16.msra.mxu0 %v4193_v9  ;;  %v4209_v9 = vpack.c.bf16 %v2495_v8, %v2492_v7 }
 0x47d   : > { %4196 = vmatprep.subr.bf16.mxu0 %v4195_v10  ;;  %v2449_v10 = vld [vmem:[#allocation19 + $0x148] sm:$0xff] }
 0x47e   : > { %v4241_v11 = vpack.c.bf16 %v2449_v10, %v2446_v3 }
 0x480   : > { %4198 = vmatpush1.bf16.msra.mxu0 %v4197_v15  ;;  %v4211_v15 = vpack.c.bf16 %v2502_v13, %v2499_v12 }
 0x481   : > { %4200 = vmatprep.subr.bf16.mxu0 %v4199_v16  ;;  %v2503_v16 = vld [vmem:[#allocation19 + $0x2f8] sm:$0xff] }
 0x482   : > { %v4243_v19 = vpack.c.bf16 %v2503_v16, %v2500_v14 }
 0x484   : > { %4202 = vmatpush1.bf16.msra.mxu0 %v4201_v21  ;;  %v2452_v21 = vld [vmem:[#allocation19 + $0x160] sm:$0xff] }
 0x485   : > { %4204 = vmatprep.subr.bf16.mxu0 %v4203_v22  ;;  %v2455_v22 = vld [vmem:[#allocation19 + $0x178] sm:$0xff] }
 0x486   : > { %v4245_v23 = vpack.c.bf16 %v2455_v22, %v2452_v21 }
 0x488   : > { %4206 = vmatpush1.bf16.msra.mxu0 %v4205_v27  ;;  %v2323_v27 = vld [vmem:[%s5342_s21] sm:$0x3]  ;;  %s4584_s21 = scalar_lea.vmem %s5248_s23, 96 }
 0x489   : > { %4208 = vmatprep.subr.bf16.mxu0 %v4207_v28  ;;  %v2331_v28 = vsub.s32 1, %v2326_v25  ;;  %p4585_p6 = scmp.ne.s32.totalorder %s5248_s23, %s4584_s21  ;;  %p4592_p0 = scmp.lt.s32.totalorder %s4590_s5, %s4584_s21 }
 0x48b   : > { %v2332_v30 = vrot.slane %v2323_v27, %v2331_v28  ;;  %p4586_p12 = pnand %p4585_p6, %p5345_p9  ;;  %p4593_p2 = por %p4592_p0, %p4591_p13 }
 0x48c   : > { %4210 = vmatpush1.bf16.msra.mxu0 %v4209_v9 }
 0x48d   : > { %4212 = vmatprep.subr.bf16.mxu0 %v4211_v15  ;;  %p4587_p1 = pneg %p4586_p12 }
 0x48f   : > { %p4594_p8 = pnand %p4593_p2, %p4587_p1 }
 0x490   : > { %4214 = vmatpush1.bf16.msra.mxu0 %v4213_v20 }
 0x526   : > { %v2286_v32 = vpop.f32.mrb[14].mxu0 }
 0x527   : > { %v2287_v35 = vadd.f32 %v2881_v29, %v2286_v32  ;;  %v3734_v36 = vpop.f32.mrb[15].mxu0  ;;  %v2328_v29 = vrot.slane %v2323_v27, %v2327_v26 }
 0x529   : > { %v2290_v38 = vmax.f32 %v2287_v35, 0.0 }
 0x52b   : > { %2400 = vmatmul.mubr.f32.vlgmr.msra.gmra.mrb[16].mxu1 %v2290_v38  ;;  %v2516_v38 = vsub.s32 2, %v2326_v25 }
 0x52c   : > { %4218 = vmatpush3.bf16.msra.mxu1 %v4217_v37  ;;  %v2504_v37 = vld [vmem:[%s5343_s30] sm:$0x7] }
 0x52d   : > { %4220 = vmatprep.subr.bf16.mxu1 %v4219_v39  ;;  %v2509_v39 = vrot.slane %v2504_v37, %v2327_v26  ;;  %v2513_v40 = vrot.slane %v2504_v37, %v2331_v28  ;;  %v2517_v0 = vrot.slane %v2504_v37, %v2516_v38 }
 0x530   : > { %4222 = vmatpush3.bf16.msra.mxu1 %v4221_v43 }
 0x531   : > { %4224 = vmatprep.subr.bf16.mxu1 %v4223_v44 }
 0x534   : > { %4226 = vmatpush3.bf16.msra.mxu1 %v4225_v49 }
 0x535   : > { %4228 = vmatprep.subr.bf16.mxu1 %v4227_v50 }
 0x538   : > { %4230 = vmatpush3.bf16.msra.mxu1 %v4229_v55 }
 0x539   : > { %4232 = vmatprep.subr.bf16.mxu1 %v4231_v56 }
 0x53c   : > { %4234 = vmatpush3.bf16.msra.mxu1 %v4233_v61  ;;  %v4680_v61 = vmov 1983009808  }
 0x53d   : > { %4236 = vmatprep.subr.bf16.mxu1 %v4235_v62  ;;  %v2685_v62 = vunpack.c.l.s4 %v4680_v61 }
 0x53f   : > { %v2686_v63 = vunpack.c.0.s8 %v2685_v62 }
 0x540   : > { %4238 = vmatpush3.bf16.msra.mxu1 %v4237_v5 }
 0x541   : > { %4240 = vmatprep.subr.bf16.mxu1 %v4239_v6  ;;  %v2689_v2 = vsub.s32 %v2686_v63, %v2326_v25 }
 0x544   : > { %4242 = vmatpush3.bf16.msra.mxu1 %v4241_v11 }
 0x545   : > { %4244 = vmatprep.subr.bf16.mxu1 %v4243_v19 }
 0x548   : > { %4246 = vmatpush3.bf16.msra.mxu1 %v4245_v23 }
 0x5fe   : > { %v2401_v31 = vpop.f32.mrb[16].mxu1 }
 0x5ff   : > { %v2402_v32 = vadd.f32 %v2401_v31, %v2328_v29  ;;  %v2403_v33 = vpop.f32.mrb[17].mxu1 }
 0x600   : > { %v2404_v34 = vadd.f32 %v2403_v33, %v2332_v30 }
 0x601   : > { %v2406_v36 = vmax.f32 %v2402_v32, 0.0 }
 0x602   : > { %v2407_v35 = vmax.f32 %v2404_v34, 0.0 }
 0x604   : > { %2585 = vmatprep.mubr.f32.mxu0 %v2407_v35  ;;  %2656 = vmatprep.mubr.f32.mxu1 %v2407_v35 }
 0x605   : > { %2586 = vmatmul.mubr.f32.vlgmr.msra.gmra.mrb[16].mxu0 %v2406_v36  ;;  %2657 = vmatmul.mubr.f32.vlgmr.msra.gmra.mrb[18].mxu1 %v2406_v36 }
 0x6d8   : > { %v2587_v41 = vpop.f32.mrb[16].mxu0  ;;  %v3187_v42 = vpop.f32.mrb[18].mxu1 }
 0x6d9   : > { %v2588_v43 = vadd.f32 %v2587_v41, %v2509_v39  ;;  %v2589_v44 = vpop.f32.mrb[17].mxu0  ;;  %v3188_v45 = vpop.f32.mrb[19].mxu1 }
 0x6da   : > { %v2590_v46 = vadd.f32 %v2589_v44, %v2513_v40  ;;  %v3189_v47 = vadd.f32 %v3188_v45, %v3187_v42 }
 0x6db   : > { %v2662_v48 = vsub.f32 0.0, %v2588_v43 }
 0x6dc   : > { %v2663_v49 = vsub.f32 0.0, %v2590_v46  ;;  %v2659_v50 = vadd.f32 %v3189_v47, %v2517_v0 }
 0x6dd   : > { %v2665_v51 = vmul.f32 1.442695, %v2662_v48 }
 0x6de   : > { %v2667_v52 = vmul.f32 1.442695, %v2663_v49  ;;  %v2664_v53 = vsub.f32 0.0, %v2659_v50 }
 0x6df   : > { %4374 = vpow2.f32 %v2665_v51 }
 0x6e0   : > { %4376 = vpow2.f32 %v2667_v52  ;;  %v2669_v54 = vmul.f32 1.442695, %v2664_v53 }
 0x6e2   : > { %4378 = vpow2.f32 %v2669_v54 }
 0x6e9   : > { %v4375_v55 = vpop.eup %4374 }
 0x6ea   : > { %v4377_v56 = vpop.eup %4376  ;;  %v2671_v57 = vadd.f32 1.0, %v4375_v55 }
 0x6eb   : > { %v2672_v58 = vadd.f32 1.0, %v4377_v56 }
 0x6ec   : > { %v4379_v59 = vpop.eup %4378  ;;  %4380 = vrcp.f32 %v2671_v57 }
 0x6ed   : > { %4382 = vrcp.f32 %v2672_v58  ;;  %v2673_v60 = vadd.f32 1.0, %v4379_v59 }
 0x6ef   : > { %4384 = vrcp.f32 %v2673_v60 }
 0x6f6   : > { %v4381_v1 = vpop.eup %4380 }
 0x6f7   : > { %v4383_v4 = vpop.eup %4382 }
 0x6f8   : > { %v2683_v5 = vcombine.low %v4381_v1, %v4383_v4 }
 0x6f9   : > { %v4385_v6 = vpop.eup %4384 }
 0x6fa   : > { %v2690_v7 = vrot.slane %v2683_v5, %v2689_v2  ;;  %v2697_v8 = vrot.slane %v4385_v6, %v2689_v2 }
 0x6fc   : > { %v2698_v3 = vcombine.low %v2690_v7, %v2697_v8 }
 0x6fe   : > { %2700 = vst [vmem:[%s545_s18] sm:$0x3f] %v2698_v3 }
 0x6ff   : > { %4597 = shalt.err (!%p4594_p8)
}
 0x700   : > { %s4598_s19 = scalar_lea.hbm %s5246_s13, 96  ;;  %s4602_s29 = scalar_lea.hbm %s5344_s22, 192 }
 0x701   : > { %p4599_p4 = scmp.ne.s32.totalorder %s5246_s13, %s4598_s19  ;;  %p4603_p3 = scmp.lt.u32.totalorder %s5246_s13, %s5344_s22 }
 0x702   : > { %p4604_p5 = scmp.lt.u32.totalorder %s4602_s29, %s4598_s19  ;;  %p4606_p6 = scmp.lt.u32.totalorder %s4598_s19, %s5246_s13 }
 0x703   : > { %p4600_p10 = pnand %p4599_p4, %p5345_p9 }
 0x704   : > { %p4605_p7 = por %p4604_p5, %p4603_p3 }
 0x705   : > { %p4601_p11 = pneg %p4600_p10 }
 0x706   : > { %p4607_p12 = por %p4606_p6, %p4605_p7 }
 0x708   : > { %p4608_p1 = pnand %p4607_p12, %p4601_p11 }
 0x70a   : > { %4611 = shalt.err (!%p4608_p1)
}
 0x70b   : > { %4283 = dma.vmem_to_hbm [thread:$0]  (%p5345_p9), %s5248_s23, 96, %s5246_s13, %s2702_s1  }
 0x70c PF: > { %s2728_s15 = sand.u32 1, %s4650_s25   ;;  %p5346_p13 = scmp.ne.s32.totalorder %s5331_s12, 0 }
 0x70d   : > { %p5347_p0 = scmp.ge.s32.totalorder %s4662_s28, 2  ;;  %s2729_s21 = scalar_lea.sflag [#allocation10], %s2728_s15 }
 0x70f   : > { %p4309_p2 = pnand %p5347_p0, %p5346_p13 }
 0x711   : > { %4645 = dma.done.wait (!%p4309_p2), %s2729_s21, 96  }
 0x712   : > { %4647 = vsyncadd (!%p4309_p2), %s2729_s21, 4294967200  ;;  %p29_p8 = scmp.ge.s32.totalorder %s4940_s20, 4   ;;  %s5348_s25 = smov %s4654_s26 }
 0x713   : > { %s5349_s26 = smov %s4658_s27  ;;  %s5350_s27 = smov %s4951_s6 }
 0x714   : > { %s5351_s28 = smov %s4940_s20  ;;  %31 = sbr.rel (!%p29_p8) target bundleno = 16 (0x10), region = 159 }
 0x71b   :  { %2734 = vsyncpa [#allocation9], 1 }
 0x71c   :  { %2736 = vsyncpa [#allocation9 + $0x1], 1 }
 0x71d   :  { %2737 = vsyncpa [#allocation12], 1 }
 0x71e   :  { %2738 = vsyncpa [#allocation15], 1 }
 0x71f   :  { %2739 = vsyncpa [#allocation18], 1 }
 0x720   :  { %2740 = vsyncpa [#allocation10], 1 }
 0x721   :  { %2742 = vsyncpa [#allocation10 + $0x1], 1 }

</bundles_post_ra>
